<compile_context>
chip_gen: v5e
topology: v5e:2x2
jax: 0.10.0
libtpu: 0.0.40
codegen_flags: <defaults>
</compile_context>

<pallas_src>
from functools import partial

import jax
import jax.numpy as jnp
from jax import lax
from jax.experimental import pallas as pl
from jax.experimental.pallas import tpu as pltpu


def _round_up(x, m):
    return (x + m - 1) // m * m


def _pick_tile(n, target):
    """Largest divisor of n that is <= target (keeps blocks exact, no masking)."""
    t = min(target, n)
    while n % t:
        t -= 1
    return t


def _sepconv_kernel(x_ref, dw_ref, pw_ref, o_ref, *, k, stride, tile_h, ow):
    """Depthwise kxk conv + pointwise 1x1 conv for one (batch, row-tile) block.

    x_ref : (Hp, Wp, Cp_in)      zero-padded input image (resident per batch n)
    dw_ref: (k, k, Cp_in)        depthwise weights  (torch w[c,0,ky,kx] -> [ky,kx,c])
    pw_ref: (Cp_in, Cp_out)      pointwise weights  (torch w[co,ci,0,0] -> [ci,co])
    o_ref : (tile_h, ow, Cp_out) output row tile
    """
    cin = x_ref.shape[-1]
    cout = pw_ref.shape[-1]

    # First input row needed by this output row-tile.
    r0 = pl.multiple_of(pl.program_id(1) * (tile_h * stride), tile_h * stride)

    w_dw = dw_ref[...]  # hoisted: (k, k, Cp_in), read once per grid step

    # Depthwise conv: k*k shifted reads straight from the ref (no strided copies
    # of the whole block), accumulated in f32 on the VPU.
    acc = jnp.zeros((tile_h, ow, cin), jnp.float32)
    for ky in range(k):
        for kx in range(k):
            if stride == 1:
                patch = x_ref[pl.ds(r0 + ky, tile_h), kx:kx + ow, :]
            else:
                patch = x_ref[pl.ds(r0 + ky, tile_h, stride),
                              pl.ds(kx, ow, stride), :]
            acc = acc + patch * w_dw[ky, kx, :]

    # Pointwise 1x1 conv: one lane-dense MXU matmul on the flattened tile.
    # NOTE: for large channel counts, casting acc / pw to bf16 (keeping the f32
    # accumulator) would double MXU throughput and halve VMEM traffic; kept f32
    # here for exact parity with the PyTorch reference at small scale.
    flat = acc.reshape(tile_h * ow, cin)
    y = jnp.dot(flat, pw_ref[...],
                preferred_element_type=jnp.float32,
                precision=lax.Precision.HIGHEST)

    o_ref[...] = y.reshape(tile_h, ow, cout)


def separable_conv2d(x_nchw, dw_weight, pw_weight, *, stride, padding,
                     tile_h_target=8):
    """SeparableConv2d.forward (NCHW in / NCHW out, torch weight layouts).

    dw_weight: (Cin, 1, k, k)   depthwise_conv2d.weight
    pw_weight: (Cout, Cin, 1, 1) pointwise_conv2d.weight
    """
    N, Cin, H, W = x_nchw.shape
    Cout = pw_weight.shape[0]
    k = dw_weight.shape[-1]
    OH = (H + 2 * padding - k) // stride + 1
    OW = (W + 2 * padding - k) // stride + 1
    Hp, Wp = H + 2 * padding, W + 2 * padding

    # Pad channels to the lane width so every load/store/matmul is lane-dense.
    Cp_in = _round_up(Cin, 128)
    Cp_out = _round_up(Cout, 128)

    # NCHW -> NHWC, spatial zero-pad, channel zero-pad (glue; fused by XLA).
    # TODO(synk): fold the spatial zero-pad into the kernel via halo index
    # clamping + edge masking instead of a separate XLA pad of the activation.
    x = jnp.transpose(x_nchw, (0, 2, 3, 1)).astype(jnp.float32)
    x = jnp.pad(x, ((0, 0), (padding, padding), (padding, padding),
                    (0, Cp_in - Cin)))

    dw = jnp.transpose(dw_weight[:, 0], (1, 2, 0)).astype(jnp.float32)   # (k,k,Cin)
    dw = jnp.pad(dw, ((0, 0), (0, 0), (0, Cp_in - Cin)))
    pw = jnp.transpose(pw_weight[:, :, 0, 0], (1, 0)).astype(jnp.float32)  # (Cin,Cout)
    pw = jnp.pad(pw, ((0, Cp_in - Cin), (0, Cp_out - Cout)))

    tile_h = _pick_tile(OH, tile_h_target)
    n_h_tiles = OH // tile_h

    # Explicit VMEM budget (double-buffered blocks + margin), valid on v7x 64MiB.
    in_block = Hp * Wp * Cp_in * 4
    out_block = tile_h * OW * Cp_out * 4
    w_bytes = (k * k * Cp_in + Cp_in * Cp_out) * 4
    est = 2 * (in_block + out_block + w_bytes)
    vmem_limit = int(min(max(2 * est + (4 << 20), 16 << 20), 48 << 20))

    kernel = partial(_sepconv_kernel, k=k, stride=stride, tile_h=tile_h, ow=OW)

    out = pl.pallas_call(
        kernel,
        out_shape=jax.ShapeDtypeStruct((N, OH, OW, Cp_out), jnp.float32),
        grid=(N, n_h_tiles),  # n outer, row-tile inner -> input stays resident per n
        in_specs=[
            pl.BlockSpec((None, Hp, Wp, Cp_in), lambda n, h: (n, 0, 0, 0)),
            pl.BlockSpec((k, k, Cp_in), lambda n, h: (0, 0, 0)),
            pl.BlockSpec((Cp_in, Cp_out), lambda n, h: (0, 0)),
        ],
        out_specs=pl.BlockSpec((None, tile_h, OW, Cp_out),
                               lambda n, h: (n, h, 0, 0)),
        compiler_params=pltpu.CompilerParams(
            dimension_semantics=("parallel", "parallel"),
            vmem_limit_bytes=vmem_limit),
    )(x, dw, pw)

    out = out[..., :Cout]                       # drop padded output channels
    return jnp.transpose(out, (0, 3, 1, 2))     # NHWC -> NCHW


# ---------------- pure-JAX reference (lax convs) for the sanity check --------
def _reference(x_nchw, dw_weight, pw_weight, *, stride, padding):
    Cin = x_nchw.shape[1]
    y = lax.conv_general_dilated(
        x_nchw, dw_weight, (stride, stride), [(padding, padding)] * 2,
        dimension_numbers=("NCHW", "OIHW", "NCHW"),
        feature_group_count=Cin, precision=lax.Precision.HIGHEST)
    y = lax.conv_general_dilated(
        y, pw_weight, (1, 1), [(0, 0)] * 2,
        dimension_numbers=("NCHW", "OIHW", "NCHW"),
        precision=lax.Precision.HIGHEST)
    return y


if __name__ == "__main__":
    # Small shapes consistent with the module: N=2, Cin=4, Cout=8, 16x16,
    # dw_kernel=3, dw_stride=1, dw_padding=1.
    N, Cin, Cout, H, W = 2, 4, 8, 16, 16
    kernel_size, stride, padding = 3, 1, 1

    key = jax.random.PRNGKey(0)
    kx, k1, k2 = jax.random.split(key, 3)

    x = jax.random.normal(kx, (N, Cin, H, W), jnp.float32)
    dw_weight = 0.1 * jax.random.normal(k1, (Cin, 1, kernel_size, kernel_size),
                                        jnp.float32)
    pw_weight = 0.1 * jax.random.normal(k2, (Cout, Cin, 1, 1), jnp.float32)

    out = separable_conv2d(x, dw_weight, pw_weight, stride=stride,
                           padding=padding)
    out = jax.block_until_ready(out)

    ref = _reference(x, dw_weight, pw_weight, stride=stride, padding=padding)
    assert out.shape == (N, Cout, H, W), out.shape
    assert jnp.allclose(out, ref, rtol=1e-4, atol=1e-4), \
        float(jnp.max(jnp.abs(out - ref)))

    print("KERNEL_OK")
</pallas_src>

<mosaic_0001>
module attributes {stable_mosaic.version = 11 : i64} {
  func.func @_sepconv_kernel(%arg0: i32, %arg1: i32, %arg2: memref<1x18x18x128xf32, #tpu.memory_space<vmem>>, %arg3: memref<3x3x128xf32, #tpu.memory_space<vmem>>, %arg4: memref<128x128xf32, #tpu.memory_space<vmem>>, %arg5: memref<1x8x16x128xf32, #tpu.memory_space<vmem>>) attributes {dimension_semantics = [#tpu.dimension_semantics<parallel>, #tpu.dimension_semantics<parallel>], iteration_bounds = array<i64: 2, 2>, scalar_prefetch = 0 : i64, scratch_operands = 0 : i64, tpu.core_type = #tpu.core_type<tc>, window_params = [{transform_indices = @transform_0, window_bounds = array<i64: 1, 18, 18, 128>}, {pipeline_mode = #tpu.pipeline_mode<synchronous>, transform_indices = @transform_1, window_bounds = array<i64: 3, 3, 128>}, {pipeline_mode = #tpu.pipeline_mode<synchronous>, transform_indices = @transform_2, window_bounds = array<i64: 128, 128>}, {transform_indices = @transform_3, window_bounds = array<i64: 1, 8, 16, 128>}]} {
    %c8_i32 = arith.constant 8 : i32
    %0 = arith.muli %arg1, %c8_i32 : i32
    %1 = tpu.assume_multiple %0, 8 : i32
    %c0 = arith.constant 0 : index
    %c0_0 = arith.constant 0 : index
    %c0_1 = arith.constant 0 : index
    %2 = vector.load %arg3[%c0, %c0_0, %c0_1] : memref<3x3x128xf32, #tpu.memory_space<vmem>>, vector<3x3x128xf32>
    %cst = arith.constant 0.000000e+00 : f32
    %3 = vector.broadcast %cst : f32 to vector<8x16x128xf32>
    %c0_i32 = arith.constant 0 : i32
    %4 = arith.addi %1, %c0_i32 : i32
    %c0_2 = arith.constant 0 : index
    %5 = arith.index_cast %4 : i32 to index
    %c0_3 = arith.constant 0 : index
    %c0_4 = arith.constant 0 : index
    %6 = vector.load %arg2[%c0_2, %5, %c0_3, %c0_4] : memref<1x18x18x128xf32, #tpu.memory_space<vmem>>, vector<1x8x16x128xf32>
    %7 = vector.shape_cast %6 : vector<1x8x16x128xf32> to vector<8x16x128xf32>
    %8 = vector.extract_strided_slice %2 {offsets = [0, 0, 0], sizes = [1, 1, 128], strides = [1, 1, 1]} : vector<3x3x128xf32> to vector<1x1x128xf32>
    %9 = vector.shape_cast %8 : vector<1x1x128xf32> to vector<128xf32>
    %10 = vector.shape_cast %9 : vector<128xf32> to vector<1x1x128xf32>
    %11 = vector.broadcast %10 : vector<1x1x128xf32> to vector<8x16x128xf32>
    %12 = arith.mulf %7, %11 : vector<8x16x128xf32>
    %13 = arith.addf %3, %12 : vector<8x16x128xf32>
    %c0_i32_5 = arith.constant 0 : i32
    %14 = arith.addi %1, %c0_i32_5 : i32
    %c0_6 = arith.constant 0 : index
    %15 = arith.index_cast %14 : i32 to index
    %c1 = arith.constant 1 : index
    %c0_7 = arith.constant 0 : index
    %16 = vector.load %arg2[%c0_6, %15, %c1, %c0_7] : memref<1x18x18x128xf32, #tpu.memory_space<vmem>>, vector<1x8x16x128xf32>
    %17 = vector.shape_cast %16 : vector<1x8x16x128xf32> to vector<8x16x128xf32>
    %18 = vector.extract_strided_slice %2 {offsets = [0, 1, 0], sizes = [1, 1, 128], strides = [1, 1, 1]} : vector<3x3x128xf32> to vector<1x1x128xf32>
    %19 = vector.shape_cast %18 : vector<1x1x128xf32> to vector<128xf32>
    %20 = vector.shape_cast %19 : vector<128xf32> to vector<1x1x128xf32>
    %21 = vector.broadcast %20 : vector<1x1x128xf32> to vector<8x16x128xf32>
    %22 = arith.mulf %17, %21 : vector<8x16x128xf32>
    %23 = arith.addf %13, %22 : vector<8x16x128xf32>
    %c0_i32_8 = arith.constant 0 : i32
    %24 = arith.addi %1, %c0_i32_8 : i32
    %c0_9 = arith.constant 0 : index
    %25 = arith.index_cast %24 : i32 to index
    %c2 = arith.constant 2 : index
    %c0_10 = arith.constant 0 : index
    %26 = vector.load %arg2[%c0_9, %25, %c2, %c0_10] : memref<1x18x18x128xf32, #tpu.memory_space<vmem>>, vector<1x8x16x128xf32>
    %27 = vector.shape_cast %26 : vector<1x8x16x128xf32> to vector<8x16x128xf32>
    %28 = vector.extract_strided_slice %2 {offsets = [0, 2, 0], sizes = [1, 1, 128], strides = [1, 1, 1]} : vector<3x3x128xf32> to vector<1x1x128xf32>
    %29 = vector.shape_cast %28 : vector<1x1x128xf32> to vector<128xf32>
    %30 = vector.shape_cast %29 : vector<128xf32> to vector<1x1x128xf32>
    %31 = vector.broadcast %30 : vector<1x1x128xf32> to vector<8x16x128xf32>
    %32 = arith.mulf %27, %31 : vector<8x16x128xf32>
    %33 = arith.addf %23, %32 : vector<8x16x128xf32>
    %c1_i32 = arith.constant 1 : i32
    %34 = arith.addi %1, %c1_i32 : i32
    %c0_11 = arith.constant 0 : index
    %35 = arith.index_cast %34 : i32 to index
    %c0_12 = arith.constant 0 : index
    %c0_13 = arith.constant 0 : index
    %36 = vector.load %arg2[%c0_11, %35, %c0_12, %c0_13] : memref<1x18x18x128xf32, #tpu.memory_space<vmem>>, vector<1x8x16x128xf32>
    %37 = vector.shape_cast %36 : vector<1x8x16x128xf32> to vector<8x16x128xf32>
    %38 = vector.extract_strided_slice %2 {offsets = [1, 0, 0], sizes = [1, 1, 128], strides = [1, 1, 1]} : vector<3x3x128xf32> to vector<1x1x128xf32>
    %39 = vector.shape_cast %38 : vector<1x1x128xf32> to vector<128xf32>
    %40 = vector.shape_cast %39 : vector<128xf32> to vector<1x1x128xf32>
    %41 = vector.broadcast %40 : vector<1x1x128xf32> to vector<8x16x128xf32>
    %42 = arith.mulf %37, %41 : vector<8x16x128xf32>
    %43 = arith.addf %33, %42 : vector<8x16x128xf32>
    %c1_i32_14 = arith.constant 1 : i32
    %44 = arith.addi %1, %c1_i32_14 : i32
    %c0_15 = arith.constant 0 : index
    %45 = arith.index_cast %44 : i32 to index
    %c1_16 = arith.constant 1 : index
    %c0_17 = arith.constant 0 : index
    %46 = vector.load %arg2[%c0_15, %45, %c1_16, %c0_17] : memref<1x18x18x128xf32, #tpu.memory_space<vmem>>, vector<1x8x16x128xf32>
    %47 = vector.shape_cast %46 : vector<1x8x16x128xf32> to vector<8x16x128xf32>
    %48 = vector.extract_strided_slice %2 {offsets = [1, 1, 0], sizes = [1, 1, 128], strides = [1, 1, 1]} : vector<3x3x128xf32> to vector<1x1x128xf32>
    %49 = vector.shape_cast %48 : vector<1x1x128xf32> to vector<128xf32>
    %50 = vector.shape_cast %49 : vector<128xf32> to vector<1x1x128xf32>
    %51 = vector.broadcast %50 : vector<1x1x128xf32> to vector<8x16x128xf32>
    %52 = arith.mulf %47, %51 : vector<8x16x128xf32>
    %53 = arith.addf %43, %52 : vector<8x16x128xf32>
    %c1_i32_18 = arith.constant 1 : i32
    %54 = arith.addi %1, %c1_i32_18 : i32
    %c0_19 = arith.constant 0 : index
    %55 = arith.index_cast %54 : i32 to index
    %c2_20 = arith.constant 2 : index
    %c0_21 = arith.constant 0 : index
    %56 = vector.load %arg2[%c0_19, %55, %c2_20, %c0_21] : memref<1x18x18x128xf32, #tpu.memory_space<vmem>>, vector<1x8x16x128xf32>
    %57 = vector.shape_cast %56 : vector<1x8x16x128xf32> to vector<8x16x128xf32>
    %58 = vector.extract_strided_slice %2 {offsets = [1, 2, 0], sizes = [1, 1, 128], strides = [1, 1, 1]} : vector<3x3x128xf32> to vector<1x1x128xf32>
    %59 = vector.shape_cast %58 : vector<1x1x128xf32> to vector<128xf32>
    %60 = vector.shape_cast %59 : vector<128xf32> to vector<1x1x128xf32>
    %61 = vector.broadcast %60 : vector<1x1x128xf32> to vector<8x16x128xf32>
    %62 = arith.mulf %57, %61 : vector<8x16x128xf32>
    %63 = arith.addf %53, %62 : vector<8x16x128xf32>
    %c2_i32 = arith.constant 2 : i32
    %64 = arith.addi %1, %c2_i32 : i32
    %c0_22 = arith.constant 0 : index
    %65 = arith.index_cast %64 : i32 to index
    %c0_23 = arith.constant 0 : index
    %c0_24 = arith.constant 0 : index
    %66 = vector.load %arg2[%c0_22, %65, %c0_23, %c0_24] : memref<1x18x18x128xf32, #tpu.memory_space<vmem>>, vector<1x8x16x128xf32>
    %67 = vector.shape_cast %66 : vector<1x8x16x128xf32> to vector<8x16x128xf32>
    %68 = vector.extract_strided_slice %2 {offsets = [2, 0, 0], sizes = [1, 1, 128], strides = [1, 1, 1]} : vector<3x3x128xf32> to vector<1x1x128xf32>
    %69 = vector.shape_cast %68 : vector<1x1x128xf32> to vector<128xf32>
    %70 = vector.shape_cast %69 : vector<128xf32> to vector<1x1x128xf32>
    %71 = vector.broadcast %70 : vector<1x1x128xf32> to vector<8x16x128xf32>
    %72 = arith.mulf %67, %71 : vector<8x16x128xf32>
    %73 = arith.addf %63, %72 : vector<8x16x128xf32>
    %c2_i32_25 = arith.constant 2 : i32
    %74 = arith.addi %1, %c2_i32_25 : i32
    %c0_26 = arith.constant 0 : index
    %75 = arith.index_cast %74 : i32 to index
    %c1_27 = arith.constant 1 : index
    %c0_28 = arith.constant 0 : index
    %76 = vector.load %arg2[%c0_26, %75, %c1_27, %c0_28] : memref<1x18x18x128xf32, #tpu.memory_space<vmem>>, vector<1x8x16x128xf32>
    %77 = vector.shape_cast %76 : vector<1x8x16x128xf32> to vector<8x16x128xf32>
    %78 = vector.extract_strided_slice %2 {offsets = [2, 1, 0], sizes = [1, 1, 128], strides = [1, 1, 1]} : vector<3x3x128xf32> to vector<1x1x128xf32>
    %79 = vector.shape_cast %78 : vector<1x1x128xf32> to vector<128xf32>
    %80 = vector.shape_cast %79 : vector<128xf32> to vector<1x1x128xf32>
    %81 = vector.broadcast %80 : vector<1x1x128xf32> to vector<8x16x128xf32>
    %82 = arith.mulf %77, %81 : vector<8x16x128xf32>
    %83 = arith.addf %73, %82 : vector<8x16x128xf32>
    %c2_i32_29 = arith.constant 2 : i32
    %84 = arith.addi %1, %c2_i32_29 : i32
    %c0_30 = arith.constant 0 : index
    %85 = arith.index_cast %84 : i32 to index
    %c2_31 = arith.constant 2 : index
    %c0_32 = arith.constant 0 : index
    %86 = vector.load %arg2[%c0_30, %85, %c2_31, %c0_32] : memref<1x18x18x128xf32, #tpu.memory_space<vmem>>, vector<1x8x16x128xf32>
    %87 = vector.shape_cast %86 : vector<1x8x16x128xf32> to vector<8x16x128xf32>
    %88 = vector.extract_strided_slice %2 {offsets = [2, 2, 0], sizes = [1, 1, 128], strides = [1, 1, 1]} : vector<3x3x128xf32> to vector<1x1x128xf32>
    %89 = vector.shape_cast %88 : vector<1x1x128xf32> to vector<128xf32>
    %90 = vector.shape_cast %89 : vector<128xf32> to vector<1x1x128xf32>
    %91 = vector.broadcast %90 : vector<1x1x128xf32> to vector<8x16x128xf32>
    %92 = arith.mulf %87, %91 : vector<8x16x128xf32>
    %93 = arith.addf %83, %92 : vector<8x16x128xf32>
    %94 = vector.shape_cast %93 : vector<8x16x128xf32> to vector<128x128xf32>
    %c0_33 = arith.constant 0 : index
    %c0_34 = arith.constant 0 : index
    %95 = vector.load %arg4[%c0_33, %c0_34] : memref<128x128xf32, #tpu.memory_space<vmem>>, vector<128x128xf32>
    %cst_35 = arith.constant dense<0.000000e+00> : vector<128x128xf32>
    %96 = tpu.matmul %94, %95, %cst_35 {dimension_numbers = #tpu.dot_dimension_numbers<[1], [0], [0], [1], [0, 0, 1, 1], [], []>, precision = #tpu.contract_precision<fp32>} : vector<128x128xf32>, vector<128x128xf32>, vector<128x128xf32> -> vector<128x128xf32>
    %97 = vector.shape_cast %96 : vector<128x128xf32> to vector<8x16x128xf32>
    %c0_36 = arith.constant 0 : index
    %c0_37 = arith.constant 0 : index
    %c0_38 = arith.constant 0 : index
    %c0_39 = arith.constant 0 : index
    %98 = vector.load %arg5[%c0_36, %c0_37, %c0_38, %c0_39] : memref<1x8x16x128xf32, #tpu.memory_space<vmem>>, vector<1x8x16x128xf32>
    %99 = vector.shape_cast %98 : vector<1x8x16x128xf32> to vector<8x16x128xf32>
    %100 = vector.shape_cast %97 : vector<8x16x128xf32> to vector<1x8x16x128xf32>
    tpu.vector_store %arg5[%c0_36, %c0_37, %c0_38, %c0_39], %100 {strides = array<i32>} : memref<1x8x16x128xf32, #tpu.memory_space<vmem>>, vector<1x8x16x128xf32>,
    return
  }
  func.func @transform_0(%arg0: i32, %arg1: i32) -> (i32, i32, i32, i32) {
    %c0_i32 = arith.constant 0 : i32
    %c0_i32_0 = arith.constant 0 : i32
    %c0_i32_1 = arith.constant 0 : i32
    %c0_i32_2 = arith.constant 0 : i32
    return %arg0, %c0_i32, %c0_i32_0, %c0_i32_1 : i32, i32, i32, i32
  }
  func.func @transform_1(%arg0: i32, %arg1: i32) -> (i32, i32, i32) {
    %c0_i32 = arith.constant 0 : i32
    %c0_i32_0 = arith.constant 0 : i32
    %c0_i32_1 = arith.constant 0 : i32
    %c0_i32_2 = arith.constant 0 : i32
    return %c0_i32, %c0_i32_0, %c0_i32_1 : i32, i32, i32
  }
  func.func @transform_2(%arg0: i32, %arg1: i32) -> (i32, i32) {
    %c0_i32 = arith.constant 0 : i32
    %c0_i32_0 = arith.constant 0 : i32
    %c0_i32_1 = arith.constant 0 : i32
    return %c0_i32, %c0_i32_0 : i32, i32
  }
  func.func @transform_3(%arg0: i32, %arg1: i32) -> (i32, i32, i32, i32) {
    %c0_i32 = arith.constant 0 : i32
    %c0_i32_0 = arith.constant 0 : i32
    %c0_i32_1 = arith.constant 0 : i32
    return %arg0, %arg1, %c0_i32, %c0_i32_0 : i32, i32, i32, i32
  }
}

</mosaic_0001>

<bundles_post_ra>
// kernel: tpu_custom_call.1
= control target key start
LH: loop header
LB: loop body
LE: loop exit
PB: predicated region body
PF: predicated region fallthrough
CT: control target
= control target key end

     0   :  { %8 = vsyncpa [#allocation3], 0  ;;  %s3154_s0 = inlined_call_operand.vmem [shape: f32[2,18,18,128], index: 0, kind: input, shape index: {}]   ;;  %s3155_s1 = inlined_call_operand.vmem [shape: f32[3,3,128], index: 1, kind: input, shape index: {}]   ;;  %s3156_s2 = inlined_call_operand.vmem [shape: f32[128,128], index: 2, kind: input, shape index: {}]   ;;  %s3157_s3 = inlined_call_operand.hbm [shape: f32[2,16,16,128], index: 3, kind: output, shape index: {}]  }
   0x1   :  { %10 = vsyncpa [#allocation3 + $0x1], 0  ;;  %s1921_s12 = smov 0   ;;  %s1923_s13 = smov 0  }
   0x2   :  { %s1925_s14 = smov 0   ;;  %s1927_s15 = smov 0  }
   0x3   :  { %s1929_s16 = smov 0   ;;  %s1931_s17 = smov 0  }
   0x4   :  { %s1933_s18 = smov 0   ;;  %s1935_s19 = smov 0  }
   0x5 LB: > { %s1580_s20 = sadd.s32 4294967295, %s1897_s19   ;;  %s1581_s21 = sadd.s32 4294967294, %s1897_s19   ;;  %s1897_s19 = sphi %s1935_s19, %s16_s19   ;;  %s1893_s18 = sphi %s1933_s18, %s3332_s18   ;;  %s1889_s17 = sphi %s1931_s17, %s3331_s17   ;;  %s1885_s16 = sphi %s1929_s16, %s3330_s16   ;;  %s1881_s15 = sphi %s1927_s15, %s3329_s15   ;;  %s1877_s14 = sphi %s1925_s14, %s3328_s14   ;;  %s1873_s13 = sphi %s1923_s13, %s3327_s13   ;;  %s1869_s12 = sphi %s1921_s12, %s3326_s12  }
   0x6   : > { %s25_s22 = sadd.s32 1, %s1889_s17  ;;  %s28_s23 = sadd.s32 1, %s1893_s18 }
   0x7   : > { %p26_p0 = scmp.ge.s32.totalorder %s25_s22, 2  ;;  %p115_p1 = scmp.ne.s32.totalorder %s1877_s14, %s1873_s13 }
   0x8   : > { %p116_p2 = scmp.eq.s32.totalorder %s1580_s20, 3  ;;  %p121_p5 = scmp.ne.s32.totalorder %s1873_s13, %s1869_s12 }
   0x9   : > { %s3334_s22 = smov (%p26_p0, %s25_s22), 0  ;;  %s3336_s23 = smov (!%p26_p0, %s28_s23), %s1893_s18 }
   0xa   : > { %s101_s24 = ssub.s32 %s1889_s17, %s3334_s22  ;;  %p1972_p3 = por %p116_p2, %p115_p1 }
   0xb   : > { %p30_p4 = scmp.ge.s32.totalorder %s3336_s23, 2  ;;  %p122_p6 = scmp.eq.s32.totalorder %s1581_s21, 3 }
   0xc   : > { %p1584_p7 = scmp.ge.s32.totalorder %s1897_s19, 1  ;;  %p154_p9 = scmp.lt.s32.totalorder %s1897_s19, 5 }
   0xd   : > { %s3338_s23 = smov (%p30_p4, %s3336_s23), 0  ;;  %p1981_p8 = por %p122_p6, %p121_p5 }
   0xe   : > { %s100_s27 = ssub.s32 %s1893_s18, %s3338_s23  ;;  %s105_s28 = sadd.s32 1, %s1877_s14 }
   0xf   : > { %s102_s29 = sor.u32 %s101_s24, %s100_s27  ;;  %p155_p10 = pnand %p1584_p7, %p154_p9 }
  0x10   : > { %p103_p11 = scmp.eq.s32.totalorder %s102_s29, 0 }
  0x11   : > { %158 = sbr.rel (%p155_p10) target bundleno = 422 (0x1a6), region = 32 }
  0x12   : > { %s1990_s30 = scalar_select %p103_p11, %s1877_s14, %s105_s28  }
  0x16   : > { %v652_v0 = vld [vmem:[%s3156_s2 + $0x78] sm:$0xff]  ;;  %v651_v1 = vld [vmem:[%s3156_s2 + $0x70] sm:$0xff]  ;;  %v650_v2 = vld [vmem:[%s3156_s2 + $0x68] sm:$0xff]  ;;  %p178_p12 = scmp.lt.s32.totalorder %s1885_s16, 1  ;;  %s1588_s28 = smul.u32 192, %s1881_s15 }
  0x17   : > { %v2002_v3 = vand.u32 4294901760, %v652_v0  ;;  %v2004_v4 = vand.u32 4294901760, %v651_v1  ;;  %v2006_v5 = vand.u32 4294901760, %v650_v2  ;;  %v649_v6 = vld [vmem:[%s3156_s2 + $0x60] sm:$0xff]  ;;  %v648_v7 = vld [vmem:[%s3156_s2 + $0x58] sm:$0xff]  ;;  %v647_v8 = vld [vmem:[%s3156_s2 + $0x50] sm:$0xff] }
  0x18   : > { %v2017_v9 = vand.u32 4294901760, %v649_v6  ;;  %v2019_v10 = vand.u32 4294901760, %v648_v7  ;;  %v2021_v11 = vand.u32 4294901760, %v647_v8  ;;  %v646_v12 = vld [vmem:[%s3156_s2 + $0x48] sm:$0xff]  ;;  %v645_v13 = vld [vmem:[%s3156_s2 + $0x40] sm:$0xff]  ;;  %s2045_s6 = scalar_select %p178_p12, %s1885_s16, 1 }
  0x19   : > { %1697 = vmatpush.msra.mxu2 %v2002_v3  ;;  %v2031_v14 = vsub.f32 %v652_v0, %v2002_v3  ;;  %v2034_v15 = vsub.f32 %v651_v1, %v2004_v4  ;;  %v2037_v16 = vsub.f32 %v650_v2, %v2006_v5  ;;  %v2039_v17 = vand.u32 4294901760, %v646_v12  ;;  %654 = vmatpush.msra.mxu0 %v2002_v3  ;;  %v644_v21 = vld [vmem:[%s3156_s2 + $0x38] sm:$0xff]  ;;  %v643_v26 = vld [vmem:[%s3156_s2 + $0x30] sm:$0xff]  ;;  %v642_v37 = vld [vmem:[%s3156_s2 + $0x28] sm:$0xff]  ;;  %s1696_s10 = sshll.u32 %s1881_s15, 4 }
  0x1a   : > { %v2048_v18 = vsub.f32 %v649_v6, %v2017_v9  ;;  %v2051_v19 = vsub.f32 %v648_v7, %v2019_v10  ;;  %v2054_v20 = vsub.f32 %v647_v8, %v2021_v11  ;;  %v2063_v25 = vand.u32 4294901760, %v645_v13  ;;  %s1729_s11 = smul.u32 432, %s2045_s6  ;;  %v641_v38 = vld [vmem:[%s3156_s2 + $0x20] sm:$0xff]  ;;  %v640_v43 = vld [vmem:[%s3156_s2 + $0x18] sm:$0xff]  ;;  %v2152_v56 = vld [vmem:[%s3156_s2 + $0x10] sm:$0xff] }
  0x1b   : > { %1698 = vmatpush.msra.mxu2 %v2004_v4  ;;  %v3168_v22 = vand.u32 4294901760, %v2031_v14  ;;  %v3167_v23 = vand.u32 4294901760, %v2034_v15  ;;  %v3165_v24 = vand.u32 4294901760, %v2037_v16  ;;  %656 = vmatpush.msra.mxu0 %v2004_v4  ;;  %v2074_v30 = vsub.f32 %v646_v12, %v2039_v17  ;;  %v185_v57 = vld [vmem:[%s3155_s1] sm:$0x7]  ;;  %v2165_v60 = vld [vmem:[%s3156_s2 + $0x8] sm:$0xff] }
  0x1c   : > { %v3164_v27 = vand.u32 4294901760, %v2048_v18  ;;  %v3163_v28 = vand.u32 4294901760, %v2051_v19  ;;  %v3162_v29 = vand.u32 4294901760, %v2054_v20  ;;  %v2086_v34 = vand.u32 4294901760, %v644_v21  ;;  %s182_s7 = scalar_lea.vmem %s3154_s0, %s1729_s11  ;;  %v186_v61 = vld [vmem:[%s3155_s1 + $0x4] sm:$0x7] }
  0x1d   : > { %1699 = vmatpush.msra.mxu2 %v2006_v5  ;;  %v817_v31 = vsub.f32 %v2031_v14, %v3168_v22  ;;  %v823_v32 = vsub.f32 %v2034_v15, %v3167_v23  ;;  %v829_v33 = vsub.f32 %v2037_v16, %v3165_v24  ;;  %658 = vmatpush.msra.mxu0 %v2006_v5  ;;  %v3160_v35 = vand.u32 4294901760, %v2074_v30  ;;  %s2142_s8 = scalar_lea.vmem %s182_s7, %s1588_s28  ;;  %s175_s7 = sand.u32 1, %s1873_s13  }
  0x1e   : > { %3236 = vst [vmem:[#allocation5_spill] sm:$0xff] %v2086_v34  ;;  %v2090_v36 = vand.u32 4294901760, %v643_v26  ;;  %v835_v41 = vsub.f32 %v2048_v18, %v3164_v27  ;;  %v2105_v42 = vsub.f32 %v645_v13, %v2063_v25  ;;  %v2116_v44 = vsub.f32 %v2051_v19, %v3163_v28  ;;  %v2178_v2 = vld [vmem:[%s2142_s8 + $0x60] sm:$0xff]  ;;  %v2252_v28 = vld [vmem:[%s2142_s8 + $0x90] sm:$0xff]  ;;  %v2275_v23 = vld [vmem:[%s2142_s8 + $0x68] sm:$0xff]  ;;  %s1692_s11 = sshll.u32 %s1885_s16, 5 }
  0x1f   : > { %v818_v39 = vand.u32 4294901760, %v817_v31  ;;  %1700 = vmatpush.msra.mxu2 %v2017_v9  ;;  %v824_v40 = vand.u32 4294901760, %v823_v32  ;;  %660 = vmatpush.msra.mxu0 %v2017_v9  ;;  %v2121_v45 = vsub.f32 %v2054_v20, %v3162_v29  ;;  %v830_v46 = vand.u32 4294901760, %v829_v33  ;;  %3245 = vst [vmem:[#allocation14_spill] sm:$0xff] %v2178_v2  ;;  %v2181_v6 = vld [vmem:[%s2142_s8 + $0x61] sm:$0xff]  ;;  %v2278_v22 = vld [vmem:[%s2142_s8 + $0x69] sm:$0xff]  ;;  %s1488_s20 = sadd.s32 %s1696_s10, %s1692_s11 }
  0x20   : > { %3237 = vst [vmem:[#allocation6_spill] sm:$0xff] %v2090_v36  ;;  %v2124_v47 = vand.u32 4294901760, %v642_v37  ;;  %v2127_v48 = vsub.f32 %v644_v21, %v2086_v34  ;;  %v2129_v49 = vand.u32 4294901760, %v641_v38  ;;  %v2134_v50 = vsub.f32 %v2074_v30, %v3160_v35  ;;  %v2193_v21 = vld [vmem:[%s2142_s8 + $0x62] sm:$0xff]  ;;  %s1693_s21 = sshll.u32 %s1488_s20, 3  ;;  %s1476_s29 = scalar_lea.sflag [#allocation3], %s175_s7 }
  0x21   : > { %1713 = vmatpush.msra.mxu3 %v818_v39  ;;  %1701 = vmatpush.msra.mxu2 %v2019_v10  ;;  %v2138_v51 = vsub.f32 %v643_v26, %v2090_v36  ;;  %v2140_v52 = vand.u32 4294901760, %v640_v43  ;;  %v836_v53 = vand.u32 4294901760, %v835_v41  ;;  %v3159_v54 = vand.u32 4294901760, %v2105_v42  ;;  %3246 = vst [vmem:[#allocation15_spill] sm:$0xff] %v2181_v6  ;;  %v637_v33 = vld [vmem:[%s3156_s2] sm:$0xff]  ;;  %s1490_s15 = scalar_lea.hbm %s3157_s3, %s1693_s21  ;;  %s1823_s10 = scalar_lea.hbm %s3157_s3, 512 }
  0x22   : > { %3238 = vst [vmem:[#allocation7_spill] sm:$0xff] %v2124_v47  ;;  %819 = vmatpush.msra.mxu1 %v818_v39  ;;  %662 = vmatpush.msra.mxu0 %v2019_v10  ;;  %v2147_v55 = vsub.f32 %v642_v37, %v2124_v47  ;;  %v3158_v58 = vand.u32 4294901760, %v2127_v48  ;;  %v2160_v59 = vsub.f32 %v641_v38, %v2129_v49  ;;  %v842_v62 = vand.u32 4294901760, %v2116_v44  ;;  %v2225_v44 = vld [vmem:[%s2142_s8 + $0x78] sm:$0xff]  ;;  %s1493_s28 = sshll.u32 %s1490_s15, 4  ;;  %s1494_s28 = int_to_ptr.hbm [resolvable:$true] %s1493_s28 }
  0x23   : > { %3239 = vst [vmem:[#allocation8_spill] sm:$0xff] %v2129_v49  ;;  %1714 = vmatpush.msra.mxu3 %v824_v40  ;;  %1702 = vmatpush.msra.mxu2 %v2021_v11  ;;  %v848_v63 = vand.u32 4294901760, %v2121_v45  ;;  %v3161_v0 = vand.u32 4294901760, %v2138_v51  ;;  %v2175_v1 = vsub.f32 %v640_v43, %v2140_v52  ;;  %v854_v7 = vand.u32 4294901760, %v2134_v50  ;;  %s1817_s4 = sshra.s32 %s1494_s28, 4  ;;  %s1818_s4 = int_to_ptr.hbm [resolvable:$true] %s1817_s4 }
  0x24   : > { %3240 = vst [vmem:[#allocation9_spill] sm:$0xff] %v2138_v51  ;;  %825 = vmatpush.msra.mxu1 %v824_v40  ;;  %664 = vmatpush.msra.mxu0 %v2021_v11  ;;  %v2186_v8 = vand.u32 4294901760, %v2152_v56  ;;  %v2188_v12 = vperm.slane %v185_v57, 0  ;;  %v2190_v13 = vperm.slane %v185_v57, 1  ;;  %v2199_v26 = vsub.f32 %v2105_v42, %v3159_v54  ;;  %v187_v40 = vld [vmem:[%s3155_s1 + $0x8] sm:$0x7]  ;;  %p1824_p2 = scmp.lt.s32.totalorder %s1818_s4, %s3157_s3 }
  0x25   : > { %3241 = vst [vmem:[#allocation10_spill] sm:$0xff] %v2140_v52  ;;  %1715 = vmatpush.msra.mxu3 %v830_v46  ;;  %1703 = vmatpush.msra.mxu2 %v2039_v17  ;;  %v3166_v31 = vand.u32 4294901760, %v2147_v55  ;;  %v2203_v32 = vand.u32 4294901760, %v2165_v60  ;;  %v2208_v37 = vperm.slane %v185_v57, 2  ;;  %v2213_v38 = vsub.f32 %v2127_v48, %v3158_v58  ;;  %v2239_v57 = vld [vmem:[%s2142_s8 + $0x79] sm:$0xff]  ;;  %s1819_s5 = scalar_lea.hbm %s1818_s4, 128 }
  0x26   : > { %3242 = vst [vmem:[#allocation11_spill] sm:$0xff] %v2147_v55  ;;  %831 = vmatpush.msra.mxu1 %v830_v46  ;;  %666 = vmatpush.msra.mxu0 %v2039_v17  ;;  %v3169_v39 = vand.u32 4294901760, %v2160_v59  ;;  %v215_v41 = vmul.f32 %v2188_v12, %v2178_v2  ;;  %v264_v43 = vmul.f32 %v2190_v13, %v2181_v6  ;;  %v3172_v46 = vand.u32 4294901760, %v2175_v1  ;;  %v2306_v2 = vld [vmem:[%s2142_s8 + $0x80] sm:$0xff]  ;;  %p1820_p13 = scmp.ne.s32.totalorder %s1818_s4, %s1819_s5  ;;  %p1825_p4 = scmp.lt.s32.totalorder %s1823_s10, %s1819_s5 }
  0x27   : > { %3243 = vst [vmem:[#allocation12_spill] sm:$0xff] %v2160_v59  ;;  %1716 = vmatpush.msra.mxu3 %v836_v53  ;;  %1704 = vmatpush.msra.mxu2 %v2063_v25  ;;  %v2231_v45 = vsub.f32 %v2138_v51, %v3161_v0  ;;  %v313_v50 = vmul.f32 %v2208_v37, %v2193_v21  ;;  %v2242_v58 = vand.u32 4294901760, %v637_v33  ;;  %v2244_v35 = vperm.slane %v186_v61, 1  ;;  %v2247_v0 = vld [vmem:[%s2142_s8 + $0x7a] sm:$0xff] }
  0x28   : > { %3244 = vst [vmem:[#allocation13_spill] sm:$0xff] %v2175_v1  ;;  %837 = vmatpush.msra.mxu1 %v836_v53  ;;  %668 = vmatpush.msra.mxu0 %v2063_v25  ;;  %v2236_v53 = vperm.slane %v186_v61, 0  ;;  %v280_v54 = vadd.f32 %v264_v43, %v215_v41  ;;  %v2249_v29 = vperm.slane %v186_v61, 2  ;;  %v2259_v27 = vsub.f32 %v2147_v55, %v3166_v31  ;;  %p1821_p0 = pnand %p1820_p13, %p1972_p3  ;;  %p1826_p5 = por %p1825_p4, %p1824_p2 }
  0x29   : > { %3247 = vst [vmem:[#allocation16_spill] sm:$0xff] %v2186_v8  ;;  %1717 = vmatpush.msra.mxu3 %v842_v62  ;;  %1705 = vmatpush.msra.mxu2 %v2086_v34  ;;  %v2263_v43 = vperm.slane %v187_v40, 0  ;;  %v866_v61 = vand.u32 4294901760, %v2213_v38  ;;  %v2269_v24 = vsub.f32 %v2160_v59, %v3169_v39  ;;  %v414_v31 = vmul.f32 %v2239_v57, %v2244_v35  ;;  %v2292_v39 = vld [vmem:[%s2142_s8 + $0x6a] sm:$0xff] }
  0x2a   : > { %3248 = vst [vmem:[#allocation17_spill] sm:$0xff] %v2193_v21  ;;  %843 = vmatpush.msra.mxu1 %v842_v62  ;;  %670 = vmatpush.msra.mxu0 %v2086_v34  ;;  %v860_v62 = vand.u32 4294901760, %v2199_v26  ;;  %v365_v41 = vmul.f32 %v2225_v44, %v2236_v53  ;;  %v329_v26 = vadd.f32 %v313_v50, %v280_v54  ;;  %v2294_v6 = vperm.slane %v187_v40, 1  ;;  %p1822_p1 = pneg %p1821_p0 }
  0x2b   : > { %3249 = vst [vmem:[#allocation18_spill] sm:$0xff] %v2203_v32  ;;  %1718 = vmatpush.msra.mxu3 %v848_v63  ;;  %1706 = vmatpush.msra.mxu2 %v2090_v36  ;;  %v2285_v38 = vsub.f32 %v2175_v1, %v3172_v46  ;;  %v463_v54 = vmul.f32 %v2247_v0, %v2249_v29 }
  0x2c   : > { %3250 = vst [vmem:[#allocation19_spill] sm:$0xff] %v2242_v58  ;;  %849 = vmatpush.msra.mxu1 %v848_v63  ;;  %672 = vmatpush.msra.mxu0 %v2090_v36  ;;  %v872_v63 = vand.u32 4294901760, %v2231_v45  ;;  %v515_v50 = vmul.f32 %v2252_v28, %v2263_v43  ;;  %v381_v21 = vadd.f32 %v365_v41, %v329_v26  ;;  %v2312_v41 = vperm.slane %v187_v40, 2  ;;  %v2380_v36 = vld [vmem:[%s2142_s8 + $0x9a] sm:$0xff]  ;;  %p1827_p6 = pnand %p1826_p5, %p1822_p1 }
  0x2d   : > { %3251 = vst [vmem:[#allocation20_spill] sm:$0xff] %v2275_v23  ;;  %1719 = vmatpush.msra.mxu3 %v854_v7  ;;  %1707 = vmatpush.msra.mxu2 %v2124_v47  ;;  %v2298_v45 = vsub.f32 %v2152_v56, %v2186_v8  ;;  %v2303_v46 = vsub.f32 %v2165_v60, %v2203_v32 }
  0x2e   : > { %3252 = vst [vmem:[#allocation21_spill] sm:$0xff] %v2278_v22  ;;  %855 = vmatpush.msra.mxu1 %v854_v7  ;;  %674 = vmatpush.msra.mxu0 %v2124_v47  ;;  %v2310_v7 = vld [vmem:[%s2142_s8 + $0x91] sm:$0xff]  ;;  %v2315_v56 = vsub.f32 %v637_v33, %v2242_v58  ;;  %v216_v26 = vmul.f32 %v2188_v12, %v2275_v23  ;;  %v2327_v33 = vld [vmem:[%s2142_s8 + $0x81] sm:$0xff]  ;;  %v878_v23 = vand.u32 4294901760, %v2259_v27 }
  0x2f   : > { %3253 = vst [vmem:[#allocation22_spill] sm:$0xff] %v2292_v39  ;;  %1720 = vmatpush.msra.mxu3 %v860_v62  ;;  %1708 = vmatpush.msra.mxu2 %v2129_v49  ;;  %v265_v60 = vmul.f32 %v2190_v13, %v2278_v22  ;;  %v430_v1 = vadd.f32 %v414_v31, %v381_v21  ;;  %v2341_v27 = vld [vmem:[%s2142_s8 + $0x82] sm:$0xff]  ;;  %v884_v21 = vand.u32 4294901760, %v2269_v24  ;;  %v3260_v24 = vand.u32 4294901760, %v2303_v46 }
  0x30   : > { %3254 = vst [vmem:[#allocation23_spill] sm:$0xff] %v2298_v45  ;;  %861 = vmatpush.msra.mxu1 %v860_v62  ;;  %676 = vmatpush.msra.mxu0 %v2129_v49  ;;  %v314_v40 = vmul.f32 %v2208_v37, %v2292_v39  ;;  %v2332_v62 = vld [vmem:[%s2142_s8 + $0x92] sm:$0xff]  ;;  %v366_v47 = vmul.f32 %v2306_v2, %v2236_v53  ;;  %v239_v22 = vld [vmem:[%s2142_s8 + $0x1] sm:$0xff] }
  0x31   : > { %3255 = vst [vmem:[#allocation24_spill] sm:$0xff] %v2303_v46  ;;  %1721 = vmatpush.msra.mxu3 %v866_v61  ;;  %1709 = vmatpush.msra.mxu2 %v2140_v52  ;;  %v281_v31 = vadd.f32 %v265_v60, %v216_v26  ;;  %v479_v59 = vadd.f32 %v463_v54, %v430_v1  ;;  %v3259_v26 = vand.u32 4294901760, %v2298_v45  ;;  %v190_v54 = vld [vmem:[%s2142_s8] sm:$0xff] }
  0x32   : > { %3256 = vst [vmem:[#allocation25_spill] sm:$0xff] %v2310_v7  ;;  %867 = vmatpush.msra.mxu1 %v866_v61  ;;  %v564_v39 = vmul.f32 %v2310_v7, %v2294_v6  ;;  %678 = vmatpush.msra.mxu0 %v2140_v52  ;;  %v415_v1 = vmul.f32 %v2327_v33, %v2244_v35 }
  0x33   : > { %3257 = vst [vmem:[#allocation26_spill] sm:$0xff] %v2315_v56  ;;  %1722 = vmatpush.msra.mxu3 %v872_v63  ;;  %1710 = vmatpush.msra.mxu2 %v2186_v8  ;;  %v895_v60 = vsub.f32 %v2298_v45, %v3259_v26  ;;  %v330_v61 = vadd.f32 %v314_v40, %v281_v31  ;;  %v2361_v40 = vld [vmem:[%s2142_s8 + $0x98] sm:$0xff]  ;;  %v288_v31 = vld [vmem:[%s2142_s8 + $0x2] sm:$0xff] }
  0x34   : > { %3258 = vst [vmem:[#allocation27_spill] sm:$0xff] %v2332_v62  ;;  %v531_v52 = vadd.f32 %v515_v50, %v479_v59  ;;  %v613_v49 = vmul.f32 %v2332_v62, %v2312_v41  ;;  %873 = vmatpush.msra.mxu1 %v872_v63  ;;  %v2357_v55 = vsub.f32 %v2303_v46, %v3260_v24  ;;  %v890_v59 = vand.u32 4294901760, %v2285_v38  ;;  %v2374_v46 = vld [vmem:[%s2142_s8 + $0x18] sm:$0xff] }
  0x35   : > { %680 = vmatpush.msra.mxu0 %v2186_v8  ;;  %1723 = vmatpush.msra.mxu3 %v878_v23  ;;  %v3261_v50 = vand.u32 4294901760, %v2315_v56  ;;  %v382_v63 = vadd.f32 %v366_v47, %v330_v61  ;;  %v464_v24 = vmul.f32 %v2341_v27, %v2249_v29  ;;  %v2377_v45 = vld [vmem:[%s2142_s8 + $0x99] sm:$0xff]  ;;  %v207_v38 = vmul.f32 %v2188_v12, %v190_v54 }
  0x36   : > { %1711 = vmatpush.msra.mxu2 %v2203_v32  ;;  %v580_v8 = vadd.f32 %v564_v39, %v531_v52  ;;  %879 = vmatpush.msra.mxu1 %v878_v23  ;;  %v896_v47 = vand.u32 4294901760, %v895_v60  ;;  %v305_v23 = vmul.f32 %v2208_v37, %v288_v31  ;;  %v2390_v52 = vld [vmem:[%s2142_s8 + $0x19] sm:$0xff]  ;;  %v357_v54 = vmul.f32 %v2374_v46, %v2236_v53 }
  0x37   : > { %v2369_v26 = vsub.f32 %v2315_v56, %v3261_v50  ;;  %682 = vmatpush.msra.mxu0 %v2203_v32  ;;  %v256_v50 = vmul.f32 %v2190_v13, %v239_v22  ;;  %1724 = vmatpush.msra.mxu3 %v884_v21  ;;  %v431_v61 = vadd.f32 %v415_v1, %v382_v63  ;;  %v2393_v39 = vld [vmem:[%s2142_s8 + $0x1a] sm:$0xff]  ;;  %v902_v60 = vand.u32 4294901760, %v2357_v55 }
  0x38   : > { %1712 = vmatpush.msra.mxu2 %v2242_v58  ;;  %v516_v56 = vmul.f32 %v2361_v40, %v2263_v43  ;;  %v629_v51 = vadd.f32 %v613_v49, %v580_v8  ;;  %885 = vmatpush.msra.mxu1 %v884_v21  ;;  %v565_v31 = vmul.f32 %v2377_v45, %v2294_v6 }
  0x39   : > { %v272_v22 = vadd.f32 %v256_v50, %v207_v38  ;;  %1725 = vmatpush.msra.mxu3 %v890_v59  ;;  %v480_v1 = vadd.f32 %v464_v24, %v431_v61  ;;  %v614_v49 = vmul.f32 %v2380_v36, %v2312_v41  ;;  %684 = vmatpush.msra.mxu0 %v2242_v58  ;;  %v2412_v24 = vld [vmem:[%s2142_s8 + $0x30] sm:$0xff]  ;;  %v908_v38 = vand.u32 4294901760, %v2369_v26 }
  0x3a   : > { %977 = vmatpush.msrb.mxu2 %v2031_v14  ;;  %v2404_v8 = vand.u32 4294901760, %v629_v51  ;;  %891 = vmatpush.msra.mxu1 %v890_v59  ;;  %v406_v63 = vmul.f32 %v2390_v52, %v2244_v35  ;;  %v455_v55 = vmul.f32 %v2393_v39, %v2249_v29  ;;  %v2416_v61 = vld [vmem:[%s2142_s8 + $0x31] sm:$0xff]  ;;  %v3263_v59 = vand.u32 4294901760, %v2031_v14 }
  0x3b   : > { %v321_v21 = vadd.f32 %v305_v23, %v272_v22  ;;  %1726 = vmatpush.msra.mxu3 %v896_v47  ;;  %v532_v50 = vadd.f32 %v516_v56, %v480_v1  ;;  %v2419_v58 = vld [vmem:[%s2142_s8 + $0x32] sm:$0xff]  ;;  %v217_v23 = vmul.f32 %v2225_v44, %v2188_v12  ;;  %v266_v22 = vmul.f32 %v2239_v57, %v2190_v13  ;;  %v191_v57 = vld [vmem:[%s2142_s8 + $0x8] sm:$0xff] }
  0x3c   : > { %3262 = vst [vmem:[#allocation28_spill] sm:$0xff] %v2404_v8  ;;  %980 = vmatpush.msrb.mxu2 %v2034_v15  ;;  %1236 = vmatpush.msrb.mxu0 %v3263_v59  ;;  %v2428_v32 = vsub.f32 %v629_v51, %v2404_v8  ;;  %v315_v26 = vmul.f32 %v2247_v0, %v2208_v37 }
  0x3d   : > { %897 = vmatpush.msra.mxu1 %v896_v47  ;;  %v373_v56 = vadd.f32 %v357_v54, %v321_v21  ;;  %1727 = vmatpush.msra.mxu3 %v902_v60  ;;  %v581_v14 = vadd.f32 %v565_v31, %v532_v50  ;;  %v507_v44 = vmul.f32 %v2412_v24, %v2263_v43  ;;  %v240_v31 = vld [vmem:[%s2142_s8 + $0x9] sm:$0xff] }
  0x3e   : > { %3264 = vst [vmem:[#allocation29_spill] sm:$0xff] %v2428_v32  ;;  %983 = vmatpush.msrb.mxu2 %v2037_v16  ;;  %v282_v1 = vadd.f32 %v266_v22, %v217_v23  ;;  %v367_v51 = vmul.f32 %v2252_v28, %v2236_v53  ;;  %v3209_v47 = vand.u32 4294901760, %v2428_v32  ;;  %v556_v54 = vmul.f32 %v2416_v61, %v2294_v6  ;;  %v289_v21 = vld [vmem:[%s2142_s8 + $0xa] sm:$0xff] }
  0x3f   : > { %903 = vmatpush.msra.mxu1 %v902_v60  ;;  %v422_v59 = vadd.f32 %v406_v63, %v373_v56  ;;  %v605_v0 = vmul.f32 %v2419_v58, %v2312_v41  ;;  %1728 = vmatpush.msra.mxu3 %v908_v38  ;;  %v630_v50 = vadd.f32 %v614_v49, %v581_v14  ;;  %v2451_v63 = vld [vmem:[%s2142_s8 + $0xa8] sm:$0xff]  ;;  %v2454_v56 = vld [vmem:[%s2142_s8 + $0x20] sm:$0xff] }
  0x40   : > { %986 = vmatpush.msrb.mxu2 %v2048_v18  ;;  %v331_v23 = vadd.f32 %v315_v26, %v282_v1  ;;  %v416_v22 = vmul.f32 %v2310_v7, %v2244_v35  ;;  %v465_v60 = vmul.f32 %v2332_v62, %v2249_v29  ;;  %v752_v34 = vsub.f32 %v2428_v32, %v3209_v47  ;;  %v2466_v62 = vld [vmem:[%s2142_s8 + $0xa9] sm:$0xff] }
  0x41   : > { %943 = vmatmul.f32.vlgmr.msra.gmra.mxu3 %v2404_v8  ;;  %909 = vmatpush.msra.mxu1 %v908_v38  ;;  %v471_v49 = vadd.f32 %v455_v55, %v422_v59  ;;  %v208_v26 = vmul.f32 %v2188_v12, %v191_v57  ;;  %v2462_v14 = vand.u32 4294901760, %v630_v50  ;;  %v2469_v7 = vld [vmem:[%s2142_s8 + $0xaa] sm:$0xff]  ;;  %v257_v47 = vmul.f32 %v2190_v13, %v240_v31  ;;  %v2474_v38 = vld [vmem:[%s2142_s8 + $0x21] sm:$0xff] }
  0x42   : > { %1105 = vmatpush.msrb.mxu3 %v2002_v3  ;;  %v383_v1 = vadd.f32 %v367_v51, %v331_v23  ;;  %v306_v8 = vmul.f32 %v2208_v37, %v289_v21  ;;  %v753_v55 = vand.u32 4294901760, %v752_v34  ;;  %v517_v59 = vmul.f32 %v2451_v63, %v2263_v43  ;;  %989 = vmatpush.msrb.mxu2 %v2051_v19  ;;  %v2484_v51 = vld [vmem:[%s2142_s8 + $0x22] sm:$0xff] }
  0x43   : > { %3265 = vst [vmem:[#allocation30_spill] sm:$0xff] %v2462_v14  ;;  %1363 = vmatpush.msrb.mxu1 %v2002_v3  ;;  %v523_v57 = vadd.f32 %v507_v44, %v471_v49  ;;  %v3266_v32 = vand.u32 4294901760, %v2034_v15  ;;  %v358_v3 = vmul.f32 %v2454_v56, %v2236_v53  ;;  %v2487_v31 = vsub.f32 %v630_v50, %v2462_v14 }
  0x44   : > { %1107 = vmatpush.msrb.mxu3 %v2004_v4  ;;  %v432_v34 = vadd.f32 %v416_v22, %v383_v1  ;;  %v273_v44 = vadd.f32 %v257_v47, %v208_v26  ;;  %754 = vmatmul.f32.vlgmr.msra.gmra.mxu2 %v753_v55  ;;  %v615_v21 = vmul.f32 %v2469_v7, %v2312_v41  ;;  %v2502_v47 = vld [vmem:[%s2142_s8 + $0x38] sm:$0xff] }
  0x45   : > { %1240 = vmatpush.msrb.mxu0 %v3266_v32  ;;  %3267 = vst [vmem:[#allocation31_spill] sm:$0xff] %v2487_v31  ;;  %1365 = vmatpush.msrb.mxu1 %v2004_v4  ;;  %v572_v15 = vadd.f32 %v556_v54, %v523_v57  ;;  %v566_v32 = vmul.f32 %v2466_v62, %v2294_v6  ;;  %v3215_v50 = vand.u32 4294901760, %v2487_v31  ;;  %v3268_v54 = vand.u32 4294901760, %v2037_v16  ;;  %v2507_v1 = vld [vmem:[%s2142_s8 + $0x39] sm:$0xff] }
  0x46   : > { %v407_v23 = vmul.f32 %v2474_v38, %v2244_v35  ;;  %1109 = vmatpush.msrb.mxu3 %v2006_v5  ;;  %v481_v22 = vadd.f32 %v465_v60, %v432_v34  ;;  %v322_v49 = vadd.f32 %v306_v8, %v273_v44  ;;  %v456_v4 = vmul.f32 %v2484_v51, %v2249_v29 }
  0x47   : > { %1244 = vmatpush.msrb.mxu0 %v3268_v54  ;;  %v621_v26 = vadd.f32 %v605_v0, %v572_v15  ;;  %992 = vmatpush.msrb.mxu2 %v2054_v20  ;;  %v218_v55 = vmul.f32 %v2306_v2, %v2188_v12  ;;  %v267_v8 = vmul.f32 %v2327_v33, %v2190_v13  ;;  %v2520_v0 = vld [vmem:[%s2142_s8 + $0x3a] sm:$0xff]  ;;  %v3269_v44 = vand.u32 4294901760, %v2048_v18 }
  0x48   : > { %1367 = vmatpush.msrb.mxu1 %v2006_v5  ;;  %v760_v60 = vsub.f32 %v2487_v31, %v3215_v50  ;;  %v533_v57 = vadd.f32 %v517_v59, %v481_v22  ;;  %1111 = vmatpush.msrb.mxu3 %v2017_v9  ;;  %v374_v16 = vadd.f32 %v358_v3, %v322_v49  ;;  %v2692_v31 = vld [vmem:[%s2142_s8 + $0x52] sm:$0xff] }
  0x49   : > { %v316_v34 = vmul.f32 %v2341_v27, %v2208_v37  ;;  %v2524_v5 = vand.u32 4294901760, %v621_v26  ;;  %947 = vmatmul.f32.gmra.mxu3 %v2462_v14  ;;  %v508_v2 = vmul.f32 %v2502_v47, %v2263_v43  ;;  %v283_v33 = vadd.f32 %v267_v8, %v218_v55  ;;  %1248 = vmatpush.msrb.mxu0 %v3269_v44 }
  0x4a   : > { %v368_v59 = vmul.f32 %v2361_v40, %v2236_v53  ;;  %v761_v3 = vand.u32 4294901760, %v760_v60  ;;  %v582_v15 = vadd.f32 %v566_v32, %v533_v57  ;;  %v423_v22 = vadd.f32 %v407_v23, %v374_v16  ;;  %1113 = vmatpush.msrb.mxu3 %v2019_v10  ;;  %995 = vmatpush.msrb.mxu2 %v2074_v30  ;;  %v2546_v23 = vld [vmem:[%s2142_s8 + $0xb0] sm:$0xff] }
  0x4b   : > { %v557_v27 = vmul.f32 %v2507_v1, %v2294_v6  ;;  %v2538_v49 = vsub.f32 %v621_v26, %v2524_v5  ;;  %911 = vmatmul.f32.vlgmr.msra.gmra.mxu1 %v2524_v5  ;;  %v606_v18 = vmul.f32 %v2520_v0, %v2312_v41  ;;  %v332_v54 = vadd.f32 %v316_v34, %v283_v33  ;;  %v2554_v16 = vld [vmem:[%s2142_s8 + $0xb1] sm:$0xff] }
  0x4c   : > { %v417_v32 = vmul.f32 %v2377_v45, %v2244_v35  ;;  %v631_v55 = vadd.f32 %v615_v21, %v582_v15  ;;  %v472_v8 = vadd.f32 %v456_v4, %v423_v22  ;;  %v466_v60 = vmul.f32 %v2380_v36, %v2249_v29  ;;  %1115 = vmatpush.msrb.mxu3 %v2021_v11  ;;  %v2557_v34 = vld [vmem:[%s2142_s8 + $0xb2] sm:$0xff] }
  0x4d   : > { %1369 = vmatpush.msrb.mxu1 %v2017_v9  ;;  %762 = vmatmul.f32.gmra.mxu2 %v761_v3  ;;  %v3216_v26 = vand.u32 4294901760, %v2538_v49  ;;  %v384_v57 = vadd.f32 %v368_v59, %v332_v54  ;;  %v209_v33 = vmul.f32 %v2374_v46, %v2188_v12  ;;  %v258_v21 = vmul.f32 %v2390_v52, %v2190_v13 }
  0x4e   : > { %v3270_v4 = vand.u32 4294901760, %v2051_v19  ;;  %v2565_v44 = vand.u32 4294901760, %v631_v55  ;;  %v524_v9 = vadd.f32 %v508_v2, %v472_v8  ;;  %v518_v3 = vmul.f32 %v2546_v23, %v2263_v43  ;;  %1117 = vmatpush.msrb.mxu3 %v2039_v17  ;;  %998 = vmatpush.msrb.mxu2 %v2105_v42 }
  0x4f   : > { %v307_v59 = vmul.f32 %v2393_v39, %v2208_v37  ;;  %v688_v46 = vsub.f32 %v2538_v49, %v3216_v26  ;;  %v433_v19 = vadd.f32 %v417_v32, %v384_v57  ;;  %v274_v52 = vadd.f32 %v258_v21, %v209_v33  ;;  %1371 = vmatpush.msrb.mxu1 %v2019_v10 }
  0x50   : > { %1252 = vmatpush.msrb.mxu0 %v3270_v4  ;;  %3271 = vst [vmem:[#allocation32_spill] sm:$0xff] %v2565_v44  ;;  %v359_v2 = vmul.f32 %v2412_v24, %v2236_v53  ;;  %v2580_v15 = vsub.f32 %v631_v55, %v2565_v44  ;;  %v573_v39 = vadd.f32 %v557_v27, %v524_v9  ;;  %v2591_v55 = vld [vmem:[%s2142_s8 + $0x48] sm:$0xff]  ;;  %v3273_v33 = vand.u32 4294901760, %v2054_v20  ;;  %v3274_v20 = vld [vmem:[#allocation25_spill] sm:$0xff] }
  0x51   : > { %v567_v22 = vmul.f32 %v2554_v16, %v2294_v6  ;;  %v616_v54 = vmul.f32 %v2557_v34, %v2312_v41  ;;  %1119 = vmatpush.msrb.mxu3 %v2063_v25  ;;  %v689_v8 = vand.u32 4294901760, %v688_v46  ;;  %v482_v32 = vadd.f32 %v466_v60, %v433_v19  ;;  %v2594_v27 = vld [vmem:[%s2142_s8 + $0x49] sm:$0xff]  ;;  %1001 = vmatpush.msrb.mxu2 %v2127_v48 }
  0x52   : > { %3272 = vst [vmem:[#allocation33_spill] sm:$0xff] %v2580_v15  ;;  %951 = vmatmul.f32.gmra.mxu3 %v2565_v44  ;;  %v323_v57 = vadd.f32 %v307_v59, %v274_v52  ;;  %v408_v10 = vmul.f32 %v2416_v61, %v2244_v35  ;;  %1256 = vmatpush.msrb.mxu0 %v3273_v33  ;;  %v3214_v21 = vand.u32 4294901760, %v2580_v15  ;;  %v2606_v19 = vld [vmem:[%s2142_s8 + $0x4a] sm:$0xff]  ;;  %v2647_v44 = vld [vmem:[%s2142_s8 + $0xc2] sm:$0xff] }
  0x53   : > { %v622_v4 = vadd.f32 %v606_v18, %v573_v39  ;;  %v457_v9 = vmul.f32 %v2419_v58, %v2249_v29  ;;  %v219_v60 = vmul.f32 %v2252_v28, %v2188_v12  ;;  %1373 = vmatpush.msrb.mxu1 %v2021_v11  ;;  %690 = vmatmul.f32.vlgmr.msra.gmra.mxu0 %v689_v8  ;;  %v3275_v18 = vld [vmem:[#allocation27_spill] sm:$0xff]  ;;  %v3277_v8 = vand.u32 4294901760, %v2074_v30 }
  0x54   : > { %v534_v59 = vadd.f32 %v518_v3, %v482_v32  ;;  %v375_v46 = vadd.f32 %v359_v2, %v323_v57  ;;  %v268_v52 = vmul.f32 %v3274_v20, %v2190_v13  ;;  %v317_v39 = vmul.f32 %v3275_v18, %v2208_v37  ;;  %v3276_v2 = vld [vmem:[#allocation5_spill] sm:$0xff] }
  0x55   : > { %v768_v33 = vsub.f32 %v2580_v15, %v3214_v21  ;;  %v2615_v28 = vand.u32 4294901760, %v622_v4  ;;  %v509_v11 = vmul.f32 %v2591_v55, %v2263_v43  ;;  %v558_v3 = vmul.f32 %v2594_v27, %v2294_v6  ;;  %1121 = vmatpush.msrb.mxu3 %v3276_v2  ;;  %1260 = vmatpush.msrb.mxu0 %v3277_v8  ;;  %v3278_v21 = vld [vmem:[#allocation9_spill] sm:$0xff] }
  0x56   : > { %v583_v32 = vadd.f32 %v567_v22, %v534_v59  ;;  %v424_v57 = vadd.f32 %v408_v10, %v375_v46  ;;  %v284_v20 = vadd.f32 %v268_v52, %v219_v60  ;;  %v369_v18 = vmul.f32 %v2451_v63, %v2236_v53  ;;  %1004 = vmatpush.msrb.mxu2 %v3278_v21  ;;  %v2636_v10 = vld [vmem:[%s2142_s8 + $0xc0] sm:$0xff]  ;;  %v3279_v60 = vld [vmem:[#allocation6_spill] sm:$0xff] }
  0x57   : > { %v769_v50 = vand.u32 4294901760, %v768_v33  ;;  %v2628_v26 = vsub.f32 %v622_v4, %v2615_v28  ;;  %915 = vmatmul.f32.gmra.mxu1 %v2615_v28  ;;  %v607_v30 = vmul.f32 %v2606_v19, %v2312_v41  ;;  %v418_v22 = vmul.f32 %v2466_v62, %v2244_v35  ;;  %1123 = vmatpush.msrb.mxu3 %v3279_v60  ;;  %v2642_v4 = vld [vmem:[%s2142_s8 + $0xc1] sm:$0xff] }
  0x58   : > { %v632_v59 = vadd.f32 %v616_v54, %v583_v32  ;;  %v473_v46 = vadd.f32 %v457_v9, %v424_v57  ;;  %v333_v52 = vadd.f32 %v317_v39, %v284_v20  ;;  %v467_v33 = vmul.f32 %v2469_v7, %v2249_v29  ;;  %1375 = vmatpush.msrb.mxu1 %v2039_v17  ;;  %v3282_v20 = vld [vmem:[#allocation11_spill] sm:$0xff] }
  0x59   : > { %770 = vmatmul.f32.gmra.mxu2 %v769_v50  ;;  %v3221_v8 = vand.u32 4294901760, %v2628_v26  ;;  %v210_v14 = vmul.f32 %v2454_v56, %v2188_v12  ;;  %v259_v54 = vmul.f32 %v2474_v38, %v2190_v13  ;;  %v308_v9 = vmul.f32 %v2484_v51, %v2208_v37 }
  0x5a   : > { %v3280_v39 = vand.u32 4294901760, %v2105_v42  ;;  %v2657_v32 = vand.u32 4294901760, %v632_v59  ;;  %v525_v17 = vadd.f32 %v509_v11, %v473_v46  ;;  %v385_v50 = vadd.f32 %v369_v18, %v333_v52  ;;  %1007 = vmatpush.msrb.mxu2 %v3282_v20  ;;  %1377 = vmatpush.msrb.mxu1 %v2063_v25  ;;  %v3283_v11 = vld [vmem:[#allocation7_spill] sm:$0xff] }
  0x5b   : > { %v519_v57 = vmul.f32 %v2636_v10, %v2263_v43  ;;  %v696_v56 = vsub.f32 %v2628_v26, %v3221_v8  ;;  %v568_v42 = vmul.f32 %v2642_v4, %v2294_v6  ;;  %v275_v38 = vadd.f32 %v259_v54, %v210_v14  ;;  %1125 = vmatpush.msrb.mxu3 %v3283_v11 }
  0x5c   : > { %1264 = vmatpush.msrb.mxu0 %v3280_v39  ;;  %3281 = vst [vmem:[#allocation25_spill] sm:$0xff] %v2657_v32  ;;  %v360_v51 = vmul.f32 %v2502_v47, %v2236_v53  ;;  %v2672_v18 = vsub.f32 %v632_v59, %v2657_v32  ;;  %v574_v46 = vadd.f32 %v558_v3, %v525_v17  ;;  %v2678_v39 = vld [vmem:[%s2142_s8 + $0x50] sm:$0xff]  ;;  %v3285_v3 = vand.u32 4294901760, %v2127_v48  ;;  %v3286_v17 = vld [vmem:[#allocation12_spill] sm:$0xff] }
  0x5d   : > { %955 = vmatmul.f32.gmra.mxu3 %v2657_v32  ;;  %v434_v25 = vadd.f32 %v418_v22, %v385_v50  ;;  %v617_v52 = vmul.f32 %v2647_v44, %v2312_v41  ;;  %v697_v8 = vand.u32 4294901760, %v696_v56  ;;  %v324_v14 = vadd.f32 %v308_v9, %v275_v38  ;;  %v2685_v59 = vld [vmem:[%s2142_s8 + $0x51] sm:$0xff]  ;;  %1010 = vmatpush.msrb.mxu2 %v3286_v17 }
  0x5e   : > { %3284 = vst [vmem:[#allocation27_spill] sm:$0xff] %v2672_v18  ;;  %v409_v54 = vmul.f32 %v2507_v1, %v2244_v35  ;;  %v458_v15 = vmul.f32 %v2520_v0, %v2249_v29  ;;  %1268 = vmatpush.msrb.mxu0 %v3285_v3  ;;  %v3228_v22 = vand.u32 4294901760, %v2672_v18  ;;  %v623_v50 = vadd.f32 %v607_v30, %v574_v46  ;;  %v3287_v56 = vld [vmem:[#allocation8_spill] sm:$0xff]  ;;  %v3290_v46 = vld [vmem:[#allocation13_spill] sm:$0xff] }
  0x5f   : > { %v483_v32 = vadd.f32 %v467_v33, %v434_v25  ;;  %v220_v9 = vmul.f32 %v2361_v40, %v2188_v12  ;;  %1379 = vmatpush.msrb.mxu1 %v3276_v2  ;;  %1127 = vmatpush.msrb.mxu3 %v3287_v56  ;;  %v376_v38 = vadd.f32 %v360_v51, %v324_v14  ;;  %v3289_v51 = vand.u32 4294901760, %v3278_v21 }
  0x60   : > { %698 = vmatmul.f32.gmra.mxu0 %v697_v8  ;;  %v510_v48 = vmul.f32 %v2678_v39, %v2263_v43  ;;  %v269_v3 = vmul.f32 %v2377_v45, %v2190_v13  ;;  %v318_v30 = vmul.f32 %v2380_v36, %v2208_v37  ;;  %v776_v33 = vsub.f32 %v2672_v18, %v3228_v22  ;;  %v2740_v18 = vld [vmem:[%s2142_s8 + $0xca] sm:$0xff] }
  0x61   : > { %v2707_v40 = vand.u32 4294901760, %v623_v50  ;;  %v535_v2 = vadd.f32 %v519_v57, %v483_v32  ;;  %v559_v8 = vmul.f32 %v2685_v59, %v2294_v6  ;;  %1272 = vmatpush.msrb.mxu0 %v3289_v51  ;;  %1013 = vmatpush.msrb.mxu2 %v3290_v46  ;;  %v425_v45 = vadd.f32 %v409_v54, %v376_v38  ;;  %v2726_v54 = vld [vmem:[%s2142_s8 + $0xc8] sm:$0xff] }
  0x62   : > { %v608_v36 = vmul.f32 %v2692_v31, %v2312_v41  ;;  %v285_v25 = vadd.f32 %v269_v3, %v220_v9  ;;  %v370_v14 = vmul.f32 %v2546_v23, %v2236_v53  ;;  %1381 = vmatpush.msrb.mxu1 %v3279_v60  ;;  %v777_v22 = vand.u32 4294901760, %v776_v33  ;;  %v2729_v38 = vld [vmem:[%s2142_s8 + $0xc9] sm:$0xff] }
  0x63   : > { %3288 = vst [vmem:[#allocation5_spill] sm:$0xff] %v2707_v40  ;;  %v2720_v32 = vsub.f32 %v623_v50, %v2707_v40  ;;  %919 = vmatmul.f32.gmra.mxu1 %v2707_v40  ;;  %v584_v21 = vadd.f32 %v568_v42, %v535_v2  ;;  %v419_v57 = vmul.f32 %v2554_v16, %v2244_v35  ;;  %v3291_v9 = vld [vmem:[#allocation10_spill] sm:$0xff]  ;;  %v3292_v33 = vand.u32 4294901760, %v3282_v20 }
  0x64   : > { %1129 = vmatpush.msrb.mxu3 %v3291_v9  ;;  %v474_v3 = vadd.f32 %v458_v15, %v425_v45  ;;  %v334_v51 = vadd.f32 %v318_v30, %v285_v25  ;;  %v468_v60 = vmul.f32 %v2557_v34, %v2249_v29  ;;  %v211_v50 = vmul.f32 %v2412_v24, %v2188_v12 }
  0x65   : > { %1276 = vmatpush.msrb.mxu0 %v3292_v33  ;;  %778 = vmatmul.f32.gmra.mxu2 %v777_v22  ;;  %v3233_v42 = vand.u32 4294901760, %v2720_v32  ;;  %v633_v2 = vadd.f32 %v617_v52, %v584_v21  ;;  %v260_v40 = vmul.f32 %v2416_v61, %v2190_v13  ;;  %v309_v15 = vmul.f32 %v2419_v58, %v2208_v37  ;;  %v3293_v22 = vld [vmem:[#allocation23_spill] sm:$0xff]  ;;  %v3296_v33 = vld [vmem:[#allocation24_spill] sm:$0xff] }
  0x66   : > { %1383 = vmatpush.msrb.mxu1 %v3283_v11  ;;  %v526_v30 = vadd.f32 %v510_v48, %v474_v3  ;;  %v386_v45 = vadd.f32 %v370_v14, %v334_v51  ;;  %v520_v24 = vmul.f32 %v2726_v54, %v2263_v43  ;;  %v569_v20 = vmul.f32 %v2729_v38, %v2294_v6  ;;  %v3294_v11 = vld [vmem:[#allocation16_spill] sm:$0xff] }
  0x67   : > { %1016 = vmatpush.msrb.mxu2 %v3293_v22  ;;  %v704_v52 = vsub.f32 %v2720_v32, %v3233_v42  ;;  %v2755_v61 = vand.u32 4294901760, %v633_v2  ;;  %v276_v25 = vadd.f32 %v260_v40, %v211_v50  ;;  %v361_v58 = vmul.f32 %v2591_v55, %v2236_v53  ;;  %1131 = vmatpush.msrb.mxu3 %v3294_v11 }
  0x68   : > { %v3295_v48 = vand.u32 4294901760, %v3286_v17  ;;  %v575_v14 = vadd.f32 %v559_v8, %v526_v30  ;;  %v435_v21 = vadd.f32 %v419_v57, %v386_v45  ;;  %v618_v3 = vmul.f32 %v2740_v18, %v2312_v41  ;;  %1385 = vmatpush.msrb.mxu1 %v3287_v56 }
  0x69   : > { %v410_v51 = vmul.f32 %v2594_v27, %v2244_v35  ;;  %1019 = vmatpush.msrb.mxu2 %v3296_v33  ;;  %v705_v42 = vand.u32 4294901760, %v704_v52  ;;  %v2768_v40 = vsub.f32 %v633_v2, %v2755_v61  ;;  %959 = vmatmul.f32.gmra.mxu3 %v2755_v61  ;;  %v325_v50 = vadd.f32 %v309_v15, %v276_v25  ;;  %v3297_v52 = vld [vmem:[#allocation18_spill] sm:$0xff] }
  0x6a   : > { %1280 = vmatpush.msrb.mxu0 %v3295_v48  ;;  %v459_v17 = vmul.f32 %v2606_v19, %v2249_v29  ;;  %v624_v8 = vadd.f32 %v608_v36, %v575_v14  ;;  %v484_v57 = vadd.f32 %v468_v60, %v435_v21  ;;  %v221_v30 = vmul.f32 %v2451_v63, %v2188_v12  ;;  %v3298_v15 = vld [vmem:[#allocation14_spill] sm:$0xff]  ;;  %v3301_v21 = vld [vmem:[#allocation15_spill] sm:$0xff] }
  0x6b   : > { %v270_v45 = vmul.f32 %v2466_v62, %v2190_v13  ;;  %1133 = vmatpush.msrb.mxu3 %v3297_v52  ;;  %706 = vmatmul.f32.gmra.mxu0 %v705_v42  ;;  %v783_v2 = vand.u32 4294901760, %v2768_v40  ;;  %v377_v48 = vadd.f32 %v361_v58, %v325_v50  ;;  %v511_v25 = vmul.f32 %v2263_v43, %v3298_v15  ;;  %v3299_v36 = vld [vmem:[#allocation26_spill] sm:$0xff]  ;;  %v3302_v15 = vld [vmem:[#allocation17_spill] sm:$0xff] }
  0x6c   : > { %v319_v56 = vmul.f32 %v2469_v7, %v2208_v37  ;;  %1022 = vmatpush.msrb.mxu2 %v3299_v36  ;;  %v2785_v60 = vand.u32 4294901760, %v624_v8  ;;  %v536_v63 = vadd.f32 %v520_v24, %v484_v57  ;;  %v371_v62 = vmul.f32 %v2636_v10, %v2236_v53  ;;  %1387 = vmatpush.msrb.mxu1 %v3291_v9  ;;  %v3303_v57 = vld [vmem:[#allocation19_spill] sm:$0xff] }
  0x6d   : > { %v286_v14 = vadd.f32 %v270_v45, %v221_v30  ;;  %v3300_v42 = vand.u32 4294901760, %v3290_v46  ;;  %v784_v58 = vsub.f32 %v2768_v40, %v783_v2  ;;  %v426_v7 = vadd.f32 %v410_v51, %v377_v48  ;;  %1135 = vmatpush.msrb.mxu3 %v3303_v57  ;;  %v1655_v30 = vld [vmem:[%s2142_s8 + $0xd8] sm:$0xff] }
  0x6e   : > { %v560_v50 = vmul.f32 %v2294_v6, %v3301_v21  ;;  %v609_v24 = vmul.f32 %v2312_v41, %v3302_v15  ;;  %v2801_v10 = vsub.f32 %v624_v8, %v2785_v60  ;;  %923 = vmatmul.f32.gmra.mxu1 %v2785_v60  ;;  %v585_v46 = vadd.f32 %v569_v20, %v536_v63 }
  0x6f   : > { %1284 = vmatpush.msrb.mxu0 %v3300_v42  ;;  %v335_v9 = vadd.f32 %v319_v56, %v286_v14  ;;  %v420_v51 = vmul.f32 %v2642_v4, %v2244_v35  ;;  %v785_v45 = vand.u32 4294901760, %v784_v58  ;;  %v475_v48 = vadd.f32 %v459_v17, %v426_v7  ;;  %1389 = vmatpush.msrb.mxu1 %v3294_v11  ;;  %v1671_v14 = vld [vmem:[%s2142_s8 + $0xd9] sm:$0xff] }
  0x70   : > { %v469_v42 = vmul.f32 %v2647_v44, %v2249_v29  ;;  %v212_v21 = vmul.f32 %v2502_v47, %v2188_v12  ;;  %v3304_v8 = vand.u32 4294901760, %v3293_v22  ;;  %v711_v20 = vand.u32 4294901760, %v2801_v10  ;;  %v1687_v4 = vld [vmem:[%s2142_s8 + $0xda] sm:$0xff] }
  0x71   : > { %v634_v56 = vadd.f32 %v618_v3, %v585_v46  ;;  %v387_v63 = vadd.f32 %v371_v62, %v335_v9  ;;  %v261_v17 = vmul.f32 %v2507_v1, %v2190_v13  ;;  %786 = vmatmul.f32.gmra.mxu2 %v785_v45  ;;  %v527_v58 = vadd.f32 %v511_v25, %v475_v48 }
  0x72   : > { %1288 = vmatpush.msrb.mxu0 %v3304_v8  ;;  %v521_v44 = vmul.f32 %v1655_v30, %v2263_v43  ;;  %v310_v47 = vmul.f32 %v2520_v0, %v2208_v37  ;;  %v362_v22 = vmul.f32 %v2678_v39, %v2236_v53  ;;  %v712_v11 = vsub.f32 %v2801_v10, %v711_v20 }
  0x73   : > { %v2827_v3 = vand.u32 4294901760, %v634_v56  ;;  %v436_v62 = vadd.f32 %v420_v51, %v387_v63  ;;  %v277_v7 = vadd.f32 %v261_v17, %v212_v21  ;;  %v3305_v1 = vand.u32 4294901760, %v3296_v33  ;;  %1391 = vmatpush.msrb.mxu1 %v3297_v52  ;;  %v3307_v63 = vld [vmem:[#allocation20_spill] sm:$0xff] }
  0x74   : > { %v576_v25 = vadd.f32 %v560_v50, %v527_v58  ;;  %v570_v15 = vmul.f32 %v1671_v14, %v2294_v6  ;;  %v619_v0 = vmul.f32 %v1687_v4, %v2312_v41  ;;  %v411_v46 = vmul.f32 %v2685_v59, %v2244_v35  ;;  %v3308_v58 = vld [vmem:[#allocation21_spill] sm:$0xff] }
  0x75   : > { %1292 = vmatpush.msrb.mxu0 %v3305_v1  ;;  %v713_v9 = vand.u32 4294901760, %v712_v11  ;;  %v2837_v30 = vsub.f32 %v634_v56, %v2827_v3  ;;  %963 = vmatmul.f32.gmra.mxu3 %v2827_v3  ;;  %v485_v51 = vadd.f32 %v469_v42, %v436_v62  ;;  %v326_v45 = vadd.f32 %v310_v47, %v277_v7  ;;  %v3309_v47 = vld [vmem:[#allocation22_spill] sm:$0xff]  ;;  %v1656_v62 = vld [vmem:[%s2142_s8 + $0xe0] sm:$0xff] }
  0x76   : > { %v3306_v33 = vand.u32 4294901760, %v3299_v36  ;;  %v625_v52 = vadd.f32 %v609_v24, %v576_v25  ;;  %v460_v50 = vmul.f32 %v2692_v31, %v2249_v29  ;;  %v222_v48 = vmul.f32 %v2546_v23, %v2188_v12  ;;  %1393 = vmatpush.msrb.mxu1 %v3303_v57 }
  0x77   : > { %v271_v21 = vmul.f32 %v2554_v16, %v2190_v13  ;;  %714 = vmatmul.f32.gmra.mxu0 %v713_v9  ;;  %v791_v8 = vand.u32 4294901760, %v2837_v30  ;;  %v537_v42 = vadd.f32 %v521_v44, %v485_v51  ;;  %v378_v56 = vadd.f32 %v362_v22, %v326_v45  ;;  %v1672_v45 = vld [vmem:[%s2142_s8 + $0xe1] sm:$0xff] }
  0x78   : > { %1296 = vmatpush.msrb.mxu0 %v3306_v33  ;;  %v320_v36 = vmul.f32 %v2557_v34, %v2208_v37  ;;  %v2852_v24 = vand.u32 4294901760, %v625_v52  ;;  %v512_v14 = vmul.f32 %v2263_v43, %v3307_v63  ;;  %v372_v16 = vmul.f32 %v2726_v54, %v2236_v53  ;;  %v1688_v33 = vld [vmem:[%s2142_s8 + $0xe2] sm:$0xff] }
  0x79   : > { %v287_v23 = vadd.f32 %v271_v21, %v222_v48  ;;  %v792_v57 = vsub.f32 %v2837_v30, %v791_v8  ;;  %v586_v4 = vadd.f32 %v570_v15, %v537_v42  ;;  %v427_v17 = vadd.f32 %v411_v46, %v378_v56  ;;  %v1597_v46 = vld [vmem:[%s2142_s8 + $0x60] sm:$0xff] }
  0x7a   : > { %v561_v34 = vmul.f32 %v2294_v6, %v3308_v58  ;;  %v2864_v44 = vsub.f32 %v625_v52, %v2852_v24  ;;  %927 = vmatmul.f32.gmra.mxu1 %v2852_v24  ;;  %v610_v22 = vmul.f32 %v2312_v41, %v3309_v47  ;;  %v421_v11 = vmul.f32 %v2729_v38, %v2244_v35  ;;  %v1613_v21 = vld [vmem:[%s2142_s8 + $0x61] sm:$0xff]  ;;  %v1647_v58 = vld [vmem:[%s2142_s8 + $0x78] sm:$0xff] }
  0x7b   : > { %v336_v54 = vadd.f32 %v320_v36, %v287_v23  ;;  %v793_v7 = vand.u32 4294901760, %v792_v57  ;;  %v635_v1 = vadd.f32 %v619_v0, %v586_v4  ;;  %v476_v25 = vadd.f32 %v460_v50, %v427_v17 }
  0x7c   : > { %v470_v15 = vmul.f32 %v2740_v18, %v2249_v29  ;;  %v719_v9 = vand.u32 4294901760, %v2864_v44  ;;  %v213_v52 = vmul.f32 %v2591_v55, %v2188_v12  ;;  %v262_v38 = vmul.f32 %v2594_v27, %v2190_v13  ;;  %v1629_v27 = vld [vmem:[%s2142_s8 + $0x62] sm:$0xff] }
  0x7d   : > { %v388_v51 = vadd.f32 %v372_v16, %v336_v54  ;;  %794 = vmatmul.f32.gmra.mxu2 %v793_v7  ;;  %v2882_v48 = vand.u32 4294901760, %v635_v1  ;;  %v528_v0 = vadd.f32 %v512_v14, %v476_v25  ;;  %v522_v50 = vmul.f32 %v1656_v62, %v2263_v43  ;;  %v1598_v62 = vld [vmem:[%s2142_s8 + $0x68] sm:$0xff]  ;;  %v1663_v25 = vld [vmem:[%s2142_s8 + $0x79] sm:$0xff] }
  0x7e   : > { %v311_v18 = vmul.f32 %v2606_v19, %v2208_v37  ;;  %v720_v42 = vsub.f32 %v2864_v44, %v719_v9  ;;  %v278_v55 = vadd.f32 %v262_v38, %v213_v52  ;;  %v363_v36 = vmul.f32 %v1597_v46, %v2236_v53  ;;  %v1679_v52 = vld [vmem:[%s2142_s8 + $0x7a] sm:$0xff] }
  0x7f   : > { %v437_v56 = vadd.f32 %v421_v11, %v388_v51  ;;  %v2894_v63 = vsub.f32 %v635_v1, %v2882_v48  ;;  %v577_v14 = vadd.f32 %v561_v34, %v528_v0  ;;  %967 = vmatmul.f32.gmra.mxu3 %v2882_v48  ;;  %v571_v19 = vmul.f32 %v1672_v45, %v2294_v6 }
  0x80   : > { %v620_v23 = vmul.f32 %v1688_v33, %v2312_v41  ;;  %v721_v16 = vand.u32 4294901760, %v720_v42  ;;  %v327_v4 = vadd.f32 %v311_v18, %v278_v55  ;;  %v412_v17 = vmul.f32 %v1613_v21, %v2244_v35  ;;  %v1648_v55 = vld [vmem:[%s2142_s8 + $0x80] sm:$0xff] }
  0x81   : > { %v486_v57 = vadd.f32 %v470_v15, %v437_v56  ;;  %v799_v47 = vand.u32 4294901760, %v2894_v63  ;;  %v626_v54 = vadd.f32 %v610_v22, %v577_v14  ;;  %v461_v34 = vmul.f32 %v1629_v27, %v2249_v29 }
  0x82   : > { %v214_v11 = vmul.f32 %v2678_v39, %v2188_v12  ;;  %722 = vmatmul.f32.gmra.mxu0 %v721_v16  ;;  %v379_v1 = vadd.f32 %v363_v36, %v327_v4  ;;  %v263_v15 = vmul.f32 %v2685_v59, %v2190_v13  ;;  %v312_v46 = vmul.f32 %v2692_v31, %v2208_v37  ;;  %v1614_v39 = vld [vmem:[%s2142_s8 + $0x69] sm:$0xff] }
  0x83   : > { %v538_v7 = vadd.f32 %v522_v50, %v486_v57  ;;  %v800_v22 = vsub.f32 %v2894_v63, %v799_v47  ;;  %v2914_v51 = vand.u32 4294901760, %v626_v54  ;;  %v513_v12 = vmul.f32 %v1647_v58, %v2263_v43  ;;  %v1630_v31 = vld [vmem:[%s2142_s8 + $0x6a] sm:$0xff] }
  0x84   : > { %v428_v33 = vadd.f32 %v412_v17, %v379_v1  ;;  %v279_v38 = vadd.f32 %v263_v15, %v214_v11  ;;  %v364_v0 = vmul.f32 %v1598_v62, %v2236_v53  ;;  %v562_v37 = vmul.f32 %v1663_v25, %v2294_v6 }
  0x85   : > { %v587_v45 = vadd.f32 %v571_v19, %v538_v7  ;;  %v801_v13 = vand.u32 4294901760, %v800_v22  ;;  %v2921_v59 = vsub.f32 %v626_v54, %v2914_v51  ;;  %931 = vmatmul.f32.gmra.mxu1 %v2914_v51  ;;  %v413_v42 = vmul.f32 %v1614_v39, %v2244_v35  ;;  %v1680_v54 = vld [vmem:[%s2142_s8 + $0x82] sm:$0xff] }
  0x86   : > { %v477_v18 = vadd.f32 %v461_v34, %v428_v33  ;;  %v328_v21 = vadd.f32 %v312_v46, %v279_v38  ;;  %v611_v53 = vmul.f32 %v1679_v52, %v2312_v41  ;;  %v462_v19 = vmul.f32 %v1630_v31, %v2249_v29 }
  0x87   : > { %v636_v50 = vadd.f32 %v620_v23, %v587_v45  ;;  %802 = vmatmul.f32.gmra.mxu2 %v801_v13  ;;  %v727_v56 = vand.u32 4294901760, %v2921_v59  ;;  %v1664_v23 = vld [vmem:[%s2142_s8 + $0x81] sm:$0xff]  ;;  %v514_v17 = vmul.f32 %v1648_v55, %v2263_v43  ;;  %v612_v15 = vmul.f32 %v1680_v54, %v2312_v41  ;;  %s1585_s8 = sshll.u32 %s175_s7, 7 }
  0x88   : > { %v529_v27 = vadd.f32 %v513_v12, %v477_v18  ;;  %v380_v14 = vadd.f32 %v364_v0, %v328_v21  ;;  %v563_v29 = vmul.f32 %v1664_v23, %v2294_v6  ;;  %v3310_v45 = vand.u32 4294901760, %v2538_v49  ;;  %s3070_s9 = scalar_lea.vmem [#allocation2], %s1585_s8 }
  0x89   : > { %v2930_v36 = vand.u32 4294901760, %v636_v50  ;;  %v728_v16 = vsub.f32 %v2921_v59, %v727_v56  ;;  %v3311_v13 = vand.u32 4294901760, %v2628_v26  ;;  %v3312_v31 = vand.u32 4294901760, %v2720_v32  ;;  %s1491_s16 = sshll.u32 %s3070_s9, 4  ;;  %s1492_s16 = int_to_ptr.vmem [resolvable:$true] %s1491_s16 }
  0x8a   : > { %v578_v35 = vadd.f32 %v562_v37, %v529_v27  ;;  %v429_v4 = vadd.f32 %v413_v42, %v380_v14 }
  0x8b   : > { %v2936_v57 = vsub.f32 %v636_v50, %v2930_v36  ;;  %971 = vmatmul.f32.gmra.mxu3 %v2930_v36  ;;  %v729_v58 = vand.u32 4294901760, %v728_v16  ;;  %v3321_v16 = vld [vmem:[#allocation30_spill] sm:$0xff] }
  0x8c   : > { %v627_v11 = vadd.f32 %v611_v53, %v578_v35  ;;  %v478_v62 = vadd.f32 %v462_v19, %v429_v4  ;;  %v3319_v53 = vld [vmem:[#allocation33_spill] sm:$0xff]  ;;  %v3322_v35 = vld [vmem:[#allocation27_spill] sm:$0xff] }
  0x8d   : > { %v807_v34 = vand.u32 4294901760, %v2936_v57  ;;  %730 = vmatmul.f32.gmra.mxu0 %v729_v58  ;;  %v3320_v55 = vand.u32 4294901760, %v3319_v53  ;;  %v3323_v4 = vand.u32 4294901760, %v3322_v35 }
  0x8e   : > { %v733_v1 = vand.u32 4294901760, %v627_v11  ;;  %v530_v25 = vadd.f32 %v514_v17, %v478_v62  ;;  %v3324_v62 = vld [vmem:[#allocation32_spill] sm:$0xff] }
  0x8f   : > { %v808_v7 = vsub.f32 %v2936_v57, %v807_v34 }
  0x90   : > { %v734_v22 = vsub.f32 %v627_v11, %v733_v1  ;;  %935 = vmatmul.f32.gmra.mxu1 %v733_v1  ;;  %v579_v43 = vadd.f32 %v563_v29, %v530_v25  ;;  %v3325_v25 = vld [vmem:[#allocation25_spill] sm:$0xff] }
  0x91   : > { %v809_v46 = vand.u32 4294901760, %v808_v7 }
  0x92   : > { %v735_v12 = vand.u32 4294901760, %v734_v22  ;;  %v628_v39 = vadd.f32 %v612_v15, %v579_v43 }
  0x93   : > { %810 = vmatmul.f32.gmra.mxu2 %v809_v46  ;;  %1139 = vmatmul.f32.vlgmr.msrb.gmra.mxu3 %v3310_v45 }
  0x94   : > { %v736_v6 = vsub.f32 %v734_v22, %v735_v12  ;;  %v741_v33 = vand.u32 4294901760, %v628_v39 }
  0x96   : > { %v737_v52 = vand.u32 4294901760, %v736_v6  ;;  %v742_v38 = vsub.f32 %v628_v39, %v741_v33 }
  0x98   : > { %738 = vmatmul.f32.gmra.mxu0 %v737_v52  ;;  %v743_v0 = vand.u32 4294901760, %v742_v38  ;;  %939 = vmatmul.f32.gmra.mxu1 %v741_v33 }
  0x9a   : > { %v744_v41 = vsub.f32 %v742_v38, %v743_v0 }
  0x9b   : > { %1025 = vmatmul.f32.vlgmr.msrb.gmra.mxu2 %v2538_v49  ;;  %1145 = vmatmul.f32.gmra.mxu3 %v3311_v13  ;;  %v3313_v49 = vld [vmem:[#allocation5_spill] sm:$0xff] }
  0x9c   : > { %v745_v37 = vand.u32 4294901760, %v744_v41 }
  0xa0   : > { %746 = vmatmul.f32.gmra.mxu0 %v745_v37  ;;  %1395 = vmatmul.f32.vlgmr.msrb.gmra.mxu1 %v2524_v5 }
  0xa3   : > { %1030 = vmatmul.f32.gmra.mxu2 %v2628_v26  ;;  %1151 = vmatmul.f32.gmra.mxu3 %v3312_v31 }
  0xa8   : > { %1298 = vmatmul.f32.vlgmr.msrb.gmra.mxu0 %v2524_v5  ;;  %1399 = vmatmul.f32.gmra.mxu1 %v2615_v28 }
  0xab   : > { %1035 = vmatmul.f32.gmra.mxu2 %v2720_v32  ;;  %1157 = vmatmul.f32.gmra.mxu3 %v711_v20 }
  0xb0   : > { %1302 = vmatmul.f32.gmra.mxu0 %v2615_v28  ;;  %1403 = vmatmul.f32.gmra.mxu1 %v3313_v49 }
  0xb3   : > { %1040 = vmatmul.f32.gmra.mxu2 %v2801_v10  ;;  %1163 = vmatmul.f32.gmra.mxu3 %v719_v9  ;;  %v3314_v10 = vld [vmem:[#allocation29_spill] sm:$0xff] }
  0xb4   : > { %v3315_v20 = vand.u32 4294901760, %v3314_v10 }
  0xb8   : > { %1306 = vmatmul.f32.gmra.mxu0 %v3313_v49  ;;  %1407 = vmatmul.f32.gmra.mxu1 %v2785_v60 }
  0xbb   : > { %1045 = vmatmul.f32.gmra.mxu2 %v2864_v44  ;;  %1169 = vmatmul.f32.gmra.mxu3 %v727_v56  ;;  %v3318_v56 = vld [vmem:[#allocation28_spill] sm:$0xff] }
  0xc0   : > { %1310 = vmatmul.f32.gmra.mxu0 %v2785_v60  ;;  %1411 = vmatmul.f32.gmra.mxu1 %v2852_v24 }
  0xc3   : > { %1050 = vmatmul.f32.gmra.mxu2 %v2921_v59  ;;  %1175 = vmatmul.f32.gmra.mxu3 %v735_v12  ;;  %v3316_v59 = vld [vmem:[#allocation31_spill] sm:$0xff] }
  0xc4   : > { %v944_v5 = vpop.f32.mrf.mxu3  ;;  %v3317_v50 = vand.u32 4294901760, %v3316_v59 }
  0xc7   : > { %v755_v26 = vpop.f32.mrf.mxu2 }
  0xc8   : > { %1314 = vmatmul.f32.gmra.mxu0 %v2852_v24  ;;  %1415 = vmatmul.f32.gmra.mxu1 %v2914_v51  ;;  %v2974_v28 = vadd.f32 %v944_v5, %v755_v26  ;;  %v2977_v32 = vpop.f32.mrf.mxu1 }
  0xcb   : > { %1055 = vmatmul.f32.gmra.mxu2 %v734_v22  ;;  %1181 = vmatmul.f32.gmra.mxu3 %v743_v0 }
  0xcc   : > { %v948_v60 = vpop.f32.mrf.mxu3 }
  0xd0   : > { %1318 = vmatmul.f32.gmra.mxu0 %v2914_v51  ;;  %1419 = vmatmul.f32.gmra.mxu1 %v733_v1  ;;  %v763_v44 = vpop.f32.mrf.mxu2  ;;  %v2983_v24 = vpop.f32.mrf.mxu0 }
  0xd1   : > { %v2981_v9 = vadd.f32 %v948_v60, %v763_v44 }
  0xd3   : > { %1060 = vmatmul.f32.gmra.mxu2 %v742_v38  ;;  %1187 = vmatmul.f32.gmra.mxu3 %v3315_v20  ;;  %v913_v38 = vadd.f32 %v2977_v32, %v2983_v24 }
  0xd4   : > { %v2988_v51 = vpop.f32.mrf.mxu1 }
  0xd5   : > { %v952_v18 = vpop.f32.mrf.mxu3 }
  0xd8   : > { %1322 = vmatmul.f32.gmra.mxu0 %v733_v1  ;;  %1423 = vmatmul.f32.gmra.mxu1 %v741_v33 }
  0xdb   : > { %1065 = vmatmul.f32.gmra.mxu2 %v3314_v10  ;;  %1193 = vmatmul.f32.gmra.mxu3 %v3317_v50 }
  0xdc   : > { %v771_v21 = vpop.f32.mrf.mxu2 }
  0xdd   : > { %v2990_v42 = vadd.f32 %v952_v18, %v771_v21  ;;  %v2996_v27 = vpop.f32.mrf.mxu0 }
  0xe0   : > { %1326 = vmatmul.f32.gmra.mxu0 %v741_v33  ;;  %1427 = vmatmul.f32.gmra.mxu1 %v3318_v56  ;;  %v2998_v14 = vpop.f32.mrf.mxu1  ;;  %v956_v19 = vpop.f32.mrf.mxu3 }
  0xe3   : > { %1070 = vmatmul.f32.gmra.mxu2 %v3316_v59  ;;  %1199 = vmatmul.f32.gmra.mxu3 %v3320_v55 }
  0xe8   : > { %1330 = vmatmul.f32.gmra.mxu0 %v3318_v56  ;;  %1431 = vmatmul.f32.gmra.mxu1 %v3321_v16  ;;  %v779_v23 = vpop.f32.mrf.mxu2  ;;  %v3007_v58 = vpop.f32.mrf.mxu0 }
  0xe9   : > { %v3005_v17 = vadd.f32 %v956_v19, %v779_v23  ;;  %v921_v44 = vadd.f32 %v2998_v14, %v3007_v58 }
  0xeb   : > { %1075 = vmatmul.f32.gmra.mxu2 %v3319_v53  ;;  %1205 = vmatmul.f32.gmra.mxu3 %v3323_v4  ;;  %v3009_v54 = vpop.f32.mrf.mxu1 }
  0xec   : > { %v960_v11 = vpop.f32.mrf.mxu3 }
  0xf0   : > { %1334 = vmatmul.f32.gmra.mxu0 %v3321_v16  ;;  %1435 = vmatmul.f32.gmra.mxu1 %v3324_v62 }
  0xf3   : > { %1080 = vmatmul.f32.gmra.mxu2 %v3322_v35  ;;  %1211 = vmatmul.f32.gmra.mxu3 %v783_v2 }
  0xf4   : > { %v787_v29 = vpop.f32.mrf.mxu2  ;;  %v3018_v1 = vpop.f32.mrf.mxu0 }
  0xf5   : > { %v3016_v7 = vadd.f32 %v960_v11, %v787_v29  ;;  %v925_v55 = vadd.f32 %v3009_v54, %v3018_v1 }
  0xf7   : > { %v3022_v15 = vpop.f32.mrf.mxu1 }
  0xf8   : > { %1338 = vmatmul.f32.gmra.mxu0 %v3324_v62  ;;  %1439 = vmatmul.f32.gmra.mxu1 %v3325_v25  ;;  %v964_v46 = vpop.f32.mrf.mxu3 }
  0xfb   : > { %1085 = vmatmul.f32.gmra.mxu2 %v2768_v40  ;;  %1217 = vmatmul.f32.gmra.mxu3 %v791_v8 }
  0xff   : > { %v3029_v22 = vpop.f32.mrf.mxu0 }
 0x100   : > { %1342 = vmatmul.f32.gmra.mxu0 %v3325_v25  ;;  %v795_v2 = vpop.f32.mrf.mxu2  ;;  %1443 = vmatmul.f32.gmra.mxu1 %v2755_v61  ;;  %v929_v11 = vadd.f32 %v3022_v15, %v3029_v22 }
 0x101   : > { %v3031_v43 = vadd.f32 %v964_v46, %v795_v2 }
 0x102   : > { %v3036_v12 = vpop.f32.mrf.mxu1  ;;  %v968_v40 = vpop.f32.mrf.mxu3 }
 0x103   : > { %1090 = vmatmul.f32.gmra.mxu2 %v2837_v30  ;;  %1223 = vmatmul.f32.gmra.mxu3 %v799_v47 }
 0x108   : > { %1346 = vmatmul.f32.gmra.mxu0 %v2755_v61  ;;  %1447 = vmatmul.f32.gmra.mxu1 %v2827_v3 }
 0x10a   : > { %v803_v8 = vpop.f32.mrf.mxu2  ;;  %v3043_v39 = vpop.f32.mrf.mxu0 }
 0x10b   : > { %1095 = vmatmul.f32.gmra.mxu2 %v2894_v63  ;;  %1229 = vmatmul.f32.gmra.mxu3 %v807_v34  ;;  %v3045_v45 = vadd.f32 %v968_v40, %v803_v8  ;;  %v933_v8 = vadd.f32 %v3036_v12, %v3043_v39 }
 0x10d   : > { %v3047_v30 = vpop.f32.mrf.mxu1 }
 0x10e   : > { %v972_v47 = vpop.f32.mrf.mxu3 }
 0x110   : > { %1350 = vmatmul.f32.gmra.mxu0 %v2827_v3  ;;  %1451 = vmatmul.f32.gmra.mxu1 %v2882_v48 }
 0x113   : > { %1100 = vmatmul.f32.gmra.mxu2 %v2936_v57 }
 0x115   : > { %v3052_v61 = vpop.f32.mrf.mxu0  ;;  %v3056_v34 = vpop.f32.mrf.mxu1 }
 0x116   : > { %v811_v63 = vpop.f32.mrf.mxu2  ;;  %v1140_v33 = vpop.f32.mrf.mxu3 }
 0x117   : > { %v3054_v6 = vadd.f32 %v972_v47, %v811_v63 }
 0x118   : > { %1354 = vmatmul.f32.gmra.mxu0 %v2882_v48  ;;  %1455 = vmatmul.f32.gmra.mxu1 %v2930_v36  ;;  %v917_v48 = vadd.f32 %v2988_v51, %v2996_v27 }
 0x11d   : > { %v3060_v52 = vpop.f32.mrf.mxu0  ;;  %v1396_v57 = vpop.f32.mrf.mxu1 }
 0x11e   : > { %v1026_v3 = vpop.f32.mrf.mxu2  ;;  %v1146_v0 = vpop.f32.mrf.mxu3 }
 0x11f   : > { %v1027_v41 = vadd.f32 %v1026_v3, %v913_v38 }
 0x120   : > { %1358 = vmatmul.f32.gmra.mxu0 %v2930_v36 }
 0x121   : > { %v1141_v13 = vadd.f32 %v1140_v33, %v1027_v41 }
 0x125   : > { %v1299_v37 = vpop.f32.mrf.mxu0  ;;  %v1400_v5 = vpop.f32.mrf.mxu1 }
 0x126   : > { %v1031_v31 = vpop.f32.mrf.mxu2  ;;  %v1300_v49 = vadd.f32 %v1299_v37, %v1141_v13  ;;  %v1152_v26 = vpop.f32.mrf.mxu3 }
 0x127   : > { %v1032_v60 = vadd.f32 %v1031_v31, %v917_v48 }
 0x128   : > { %v1397_v10 = vadd.f32 %v1396_v57, %v1300_v49 }
 0x129   : > { %v1147_v36 = vadd.f32 %v1146_v0, %v1032_v60  ;;  %v937_v0 = vadd.f32 %v3047_v30, %v3052_v61 }
 0x12a   : > { %1459 = vst [vmem:[%s3070_s9] sm:$0xff] %v1397_v10 }
 0x12d   : > { %v1303_v32 = vpop.f32.mrf.mxu0  ;;  %v1404_v59 = vpop.f32.mrf.mxu1 }
 0x12e   : > { %v1036_v20 = vpop.f32.mrf.mxu2  ;;  %v1304_v24 = vadd.f32 %v1303_v32, %v1147_v36  ;;  %v1158_v50 = vpop.f32.mrf.mxu3 }
 0x12f   : > { %v1037_v51 = vadd.f32 %v1036_v20, %v921_v44 }
 0x130   : > { %v1401_v18 = vadd.f32 %v1400_v5, %v1304_v24  ;;  %v941_v5 = vadd.f32 %v3056_v34, %v3060_v52 }
 0x131   : > { %v1153_v21 = vadd.f32 %v1152_v26, %v1037_v51 }
 0x132   : > { %1460 = vst [vmem:[%s3070_s9 + $0x8] sm:$0xff] %v1401_v18 }
 0x135   : > { %v1307_v56 = vpop.f32.mrf.mxu0  ;;  %v1408_v19 = vpop.f32.mrf.mxu1 }
 0x136   : > { %v1041_v53 = vpop.f32.mrf.mxu2  ;;  %v1308_v27 = vadd.f32 %v1307_v56, %v1153_v21  ;;  %v1164_v16 = vpop.f32.mrf.mxu3 }
 0x137   : > { %v1042_v23 = vadd.f32 %v1041_v53, %v925_v55 }
 0x138   : > { %v1405_v35 = vadd.f32 %v1404_v59, %v1308_v27 }
 0x139   : > { %v1159_v14 = vadd.f32 %v1158_v50, %v1042_v23 }
 0x13a   : > { %1461 = vst [vmem:[%s3070_s9 + $0x10] sm:$0xff] %v1405_v35 }
 0x13d   : > { %v1311_v4 = vpop.f32.mrf.mxu0  ;;  %v1412_v29 = vpop.f32.mrf.mxu1 }
 0x13e   : > { %v1046_v58 = vpop.f32.mrf.mxu2  ;;  %v1312_v62 = vadd.f32 %v1311_v4, %v1159_v14  ;;  %v1170_v25 = vpop.f32.mrf.mxu3 }
 0x13f   : > { %v1047_v46 = vadd.f32 %v1046_v58, %v929_v11 }
 0x140   : > { %v1409_v2 = vadd.f32 %v1408_v19, %v1312_v62 }
 0x141   : > { %v1165_v54 = vadd.f32 %v1164_v16, %v1047_v46 }
 0x142   : > { %1462 = vst [vmem:[%s3070_s9 + $0x18] sm:$0xff] %v1409_v2 }
 0x145   : > { %v1315_v1 = vpop.f32.mrf.mxu0  ;;  %v1416_v63 = vpop.f32.mrf.mxu1 }
 0x146   : > { %v1051_v40 = vpop.f32.mrf.mxu2  ;;  %v1316_v47 = vadd.f32 %v1315_v1, %v1165_v54  ;;  %v1176_v33 = vpop.f32.mrf.mxu3 }
 0x147   : > { %v1052_v3 = vadd.f32 %v1051_v40, %v933_v8 }
 0x148   : > { %v1413_v38 = vadd.f32 %v1412_v29, %v1316_v47 }
 0x149   : > { %v1171_v15 = vadd.f32 %v1170_v25, %v1052_v3 }
 0x14a   : > { %1463 = vst [vmem:[%s3070_s9 + $0x20] sm:$0xff] %v1413_v38 }
 0x14d   : > { %v1319_v22 = vpop.f32.mrf.mxu0  ;;  %v1420_v13 = vpop.f32.mrf.mxu1 }
 0x14e   : > { %v1056_v57 = vpop.f32.mrf.mxu2  ;;  %v1320_v41 = vadd.f32 %v1319_v22, %v1171_v15  ;;  %v1182_v37 = vpop.f32.mrf.mxu3 }
 0x14f   : > { %v1057_v31 = vadd.f32 %v1056_v57, %v937_v0 }
 0x150   : > { %v1417_v48 = vadd.f32 %v1416_v63, %v1320_v41 }
 0x151   : > { %v1177_v12 = vadd.f32 %v1176_v33, %v1057_v31 }
 0x152   : > { %1464 = vst [vmem:[%s3070_s9 + $0x28] sm:$0xff] %v1417_v48 }
 0x155   : > { %v1323_v39 = vpop.f32.mrf.mxu0  ;;  %v1424_v60 = vpop.f32.mrf.mxu1 }
 0x156   : > { %v1061_v49 = vpop.f32.mrf.mxu2  ;;  %v1324_v26 = vadd.f32 %v1323_v39, %v1177_v12  ;;  %v1188_v10 = vpop.f32.mrf.mxu3 }
 0x157   : > { %v1062_v36 = vadd.f32 %v1061_v49, %v941_v5 }
 0x158   : > { %v1421_v32 = vadd.f32 %v1420_v13, %v1324_v26 }
 0x159   : > { %v1183_v30 = vadd.f32 %v1182_v37, %v1062_v36 }
 0x15a   : > { %1465 = vst [vmem:[%s3070_s9 + $0x30] sm:$0xff] %v1421_v32 }
 0x15d   : > { %v1327_v61 = vpop.f32.mrf.mxu0  ;;  %v1428_v24 = vpop.f32.mrf.mxu1 }
 0x15e   : > { %v1066_v20 = vpop.f32.mrf.mxu2  ;;  %v1328_v44 = vadd.f32 %v1327_v61, %v1183_v30  ;;  %v1194_v59 = vpop.f32.mrf.mxu3 }
 0x15f   : > { %v1067_v50 = vadd.f32 %v1066_v20, %v2974_v28 }
 0x160   : > { %v1425_v51 = vadd.f32 %v1424_v60, %v1328_v44 }
 0x161   : > { %v1189_v18 = vadd.f32 %v1188_v10, %v1067_v50 }
 0x162   : > { %1466 = vst [vmem:[%s3070_s9 + $0x38] sm:$0xff] %v1425_v51 }
 0x165   : > { %v1331_v21 = vpop.f32.mrf.mxu0  ;;  %v1432_v56 = vpop.f32.mrf.mxu1 }
 0x166   : > { %v1071_v34 = vpop.f32.mrf.mxu2  ;;  %v1332_v52 = vadd.f32 %v1331_v21, %v1189_v18  ;;  %v1200_v53 = vpop.f32.mrf.mxu3 }
 0x167   : > { %v1072_v55 = vadd.f32 %v1071_v34, %v2981_v9 }
 0x168   : > { %v1429_v27 = vadd.f32 %v1428_v24, %v1332_v52 }
 0x169   : > { %v1195_v19 = vadd.f32 %v1194_v59, %v1072_v55 }
 0x16a   : > { %1467 = vst [vmem:[%s3070_s9 + $0x40] sm:$0xff] %v1429_v27 }
 0x16d   : > { %v1335_v16 = vpop.f32.mrf.mxu0  ;;  %v1436_v14 = vpop.f32.mrf.mxu1 }
 0x16e   : > { %v1076_v23 = vpop.f32.mrf.mxu2  ;;  %v1336_v35 = vadd.f32 %v1335_v16, %v1195_v19  ;;  %v1206_v28 = vpop.f32.mrf.mxu3 }
 0x16f   : > { %v1077_v4 = vadd.f32 %v1076_v23, %v2990_v42 }
 0x170   : > { %v1433_v58 = vadd.f32 %v1432_v56, %v1336_v35 }
 0x171   : > { %v1201_v11 = vadd.f32 %v1200_v53, %v1077_v4 }
 0x172   : > { %1468 = vst [vmem:[%s3070_s9 + $0x48] sm:$0xff] %v1433_v58 }
 0x175   : > { %v1339_v62 = vpop.f32.mrf.mxu0  ;;  %v1440_v46 = vpop.f32.mrf.mxu1 }
 0x176   : > { %v1081_v29 = vpop.f32.mrf.mxu2  ;;  %v1340_v25 = vadd.f32 %v1339_v62, %v1201_v11  ;;  %v1212_v54 = vpop.f32.mrf.mxu3 }
 0x177   : > { %v1082_v9 = vadd.f32 %v1081_v29, %v3005_v17 }
 0x178   : > { %v1437_v2 = vadd.f32 %v1436_v14, %v1340_v25 }
 0x179   : > { %v1207_v1 = vadd.f32 %v1206_v28, %v1082_v9 }
 0x17a   : > { %1469 = vst [vmem:[%s3070_s9 + $0x50] sm:$0xff] %v1437_v2 }
 0x17d   : > { %v1343_v40 = vpop.f32.mrf.mxu0  ;;  %v1444_v63 = vpop.f32.mrf.mxu1 }
 0x17e   : > { %v1086_v8 = vpop.f32.mrf.mxu2  ;;  %v1344_v47 = vadd.f32 %v1343_v40, %v1207_v1  ;;  %v1218_v38 = vpop.f32.mrf.mxu3 }
 0x17f   : > { %v1087_v42 = vadd.f32 %v1086_v8, %v3016_v7 }
 0x180   : > { %v1441_v33 = vadd.f32 %v1440_v46, %v1344_v47 }
 0x181   : > { %v1213_v3 = vadd.f32 %v1212_v54, %v1087_v42 }
 0x182   : > { %1470 = vst [vmem:[%s3070_s9 + $0x58] sm:$0xff] %v1441_v33 }
 0x185   : > { %v1347_v15 = vpop.f32.mrf.mxu0  ;;  %v1448_v41 = vpop.f32.mrf.mxu1 }
 0x186   : > { %v1091_v17 = vpop.f32.mrf.mxu2  ;;  %v1348_v22 = vadd.f32 %v1347_v15, %v1213_v3  ;;  %v1224_v37 = vpop.f32.mrf.mxu3 }
 0x187   : > { %v1092_v57 = vadd.f32 %v1091_v17, %v3031_v43 }
 0x188   : > { %v1445_v0 = vadd.f32 %v1444_v63, %v1348_v22 }
 0x189   : > { %v1219_v13 = vadd.f32 %v1218_v38, %v1092_v57 }
 0x18a   : > { %1471 = vst [vmem:[%s3070_s9 + $0x60] sm:$0xff] %v1445_v0 }
 0x18d   : > { %v1351_v31 = vpop.f32.mrf.mxu0  ;;  %v1452_v5 = vpop.f32.mrf.mxu1 }
 0x18e   : > { %v1096_v48 = vpop.f32.mrf.mxu2  ;;  %v1352_v7 = vadd.f32 %v1351_v31, %v1219_v13  ;;  %v1230_v10 = vpop.f32.mrf.mxu3 }
 0x18f   : > { %v1097_v12 = vadd.f32 %v1096_v48, %v3045_v45 }
 0x190   : > { %v1449_v39 = vadd.f32 %v1448_v41, %v1352_v7 }
 0x191   : > { %v1225_v49 = vadd.f32 %v1224_v37, %v1097_v12 }
 0x192   : > { %1472 = vst [vmem:[%s3070_s9 + $0x68] sm:$0xff] %v1449_v39 }
 0x195   : > { %v1355_v43 = vpop.f32.mrf.mxu0  ;;  %v1456_v61 = vpop.f32.mrf.mxu1 }
 0x196   : > { %v1101_v26 = vpop.f32.mrf.mxu2  ;;  %v1356_v60 = vadd.f32 %v1355_v43, %v1225_v49 }
 0x197   : > { %v1102_v36 = vadd.f32 %v1101_v26, %v3054_v6 }
 0x198   : > { %v1453_v32 = vadd.f32 %v1452_v5, %v1356_v60 }
 0x199   : > { %v1231_v45 = vadd.f32 %v1230_v10, %v1102_v36 }
 0x19a   : > { %1473 = vst [vmem:[%s3070_s9 + $0x70] sm:$0xff] %v1453_v32 }
 0x19d   : > { %v1359_v30 = vpop.f32.mrf.mxu0 }
 0x19e   : > { %v1360_v20 = vadd.f32 %v1359_v30, %v1231_v45 }
 0x1a0   : > { %v1457_v44 = vadd.f32 %v1456_v61, %v1360_v20 }
 0x1a2   : > { %1474 = vst [vmem:[%s3070_s9 + $0x78] sm:$0xff] %v1457_v44 }
 0x1a3   : > { %1830 = shalt.err (!%p1827_p6)
}
 0x1a4   : > { %s1899_s7 = smov 128   ;;  %s1900_s9 = smov 8  }
 0x1a5   : > { %1730 = dma.vmem_to_hbm [thread:$0]  (%p1972_p3), %s1492_s16, 2048, %s1494_s28, %s1476_s29, %s1899_s7, %s1899_s7, %s1900_s9  }
 0x1a6 PF: > { %p1736_p7 = scmp.ge.s32.totalorder %s1897_s19, 2  ;;  %s1508_s21 = sand.u32 1, %s1869_s12  }
 0x1a7   : > { %s1509_s24 = scalar_lea.sflag [#allocation3], %s1508_s21 }
 0x1a8   : > { %p1733_p9 = pnand %p1736_p7, %p1981_p8 }
 0x1aa   : > { %p1734_p10 = pneg %p1733_p9 }
 0x1ac   : > { %1864 = dma.done.wait (%p1734_p10), %s1509_s24, 2048  }
 0x1ad   : > { %1866 = vsyncadd (%p1734_p10), %s1509_s24, 4294965248  ;;  %s16_s19 = sadd.s32 1, %s1897_s19   ;;  %s3326_s12 = smov %s1873_s13 }
 0x1ae   : > { %p13_p11 = scmp.ge.s32.totalorder %s16_s19, 6   ;;  %s3327_s13 = smov %s1877_s14 }
 0x1af   : > { %s3328_s14 = smov %s1990_s30  ;;  %s3329_s15 = smov %s1889_s17 }
 0x1b0   : > { %s3330_s16 = smov %s1893_s18  ;;  %s3331_s17 = smov %s3334_s22 }
 0x1b1   : > { %s3332_s18 = smov %s3338_s23  ;;  %15 = sbr.rel (!%p13_p11) target bundleno = 5 (0x5), region = 70 }
 0x1b6   :  { %1515 = vsyncpa [#allocation3], 1 }
 0x1b7   :  { %1517 = vsyncpa [#allocation3 + $0x1], 1 }

</bundles_post_ra>
